<compile_context>
chip_gen: v7x
topology: tpu7x:2x2x1
jax: 0.10.0
libtpu: 0.0.40
codegen_flags: <defaults>
</compile_context>

<pallas_src>
import jax
import jax.numpy as jnp
from jax.experimental import pallas as pl
from jax.experimental.pallas import tpu as pltpu

BN_EPS = 1e-5
H1, H2, NPAD = 1024, 256, 128  # hidden sizes; fc3 output padded 2 -> 128 lanes


def netd_inst_kernel(x_ref, w1_ref, w2_ref, w3_ref, p_ref, out_ref, h1_acc):
    k = pl.program_id(0)

    # ---- fc_1_inst, streamed over K: (B, tk) bf16 @ (tk, 1024) bf16 -> f32 ----
    part = jnp.dot(x_ref[...], w1_ref[...], preferred_element_type=jnp.float32)

    @pl.when(k == 0)
    def _():
        # First K step: write directly and fold b1 in (no zero-fill, no RMW).
        h1_acc[...] = part + p_ref[:, 0:H1]

    @pl.when(k > 0)
    def _():
        h1_acc[...] += part

    # ---- fc2 / fc3 / BN / ReLUs only on the last K step ----
    @pl.when(k == pl.num_programs(0) - 1)
    def _():
        b2 = p_ref[:, H1:H1 + H2]
        gamma = p_ref[:, H1 + H2:H1 + H2 + NPAD]
        beta = p_ref[:, H1 + H2 + NPAD:H1 + H2 + 2 * NPAD]

        h1 = jnp.maximum(h1_acc[...], 0.0)  # b1 already folded in at k==0

        h2 = jnp.dot(h1.astype(jnp.bfloat16), w2_ref[...],
                     preferred_element_type=jnp.float32)
        h2 = jnp.maximum(h2 + b2, 0.0)

        # fc_3_inst without b3: the constant bias cancels in (z - mean) below.
        z = jnp.dot(h2.astype(jnp.bfloat16), w3_ref[...],
                    preferred_element_type=jnp.float32)

        # BatchNorm1d, training mode (biased batch statistics) over the full batch.
        mean = jnp.mean(z, axis=0, keepdims=True)
        var = jnp.mean((z - mean) * (z - mean), axis=0, keepdims=True)
        z_hat = (z - mean) * jax.lax.rsqrt(var + BN_EPS)
        out_ref[...] = jnp.maximum(gamma * z_hat + beta, 0.0)


def prepare_netd_inst_params(params):
    """One-time weight re-layout (transpose, bf16 cast, fc3 lane padding, bias pack).

    Call this ONCE and reuse the result for every forward call; doing this per
    call costs 2-3x the kernel's own HBM traffic.
    """
    w1 = params["w1"].T.astype(jnp.bfloat16)                       # (F, 1024)
    w2 = params["w2"].T.astype(jnp.bfloat16)                       # (1024, 256)
    w3 = jnp.zeros((H2, NPAD), jnp.bfloat16).at[:, :2].set(
        params["w3"].T.astype(jnp.bfloat16))                       # lane-dense fc3
    packed = jnp.concatenate([
        params["b1"].reshape(1, H1),
        params["b2"].reshape(1, H2),
        jnp.zeros((1, NPAD), jnp.float32).at[:, :2].set(params["gamma"].reshape(1, -1)),
        jnp.zeros((1, NPAD), jnp.float32).at[:, :2].set(params["beta"].reshape(1, -1)),
    ], axis=1).astype(jnp.float32)                                 # (1, 1536)
    return {"w1": w1, "w2": w2, "w3": w3, "packed": packed}


def netd_inst_forward(x, prepped, tk=None):
    """x: (B, fc_size) float32.  prepped: output of prepare_netd_inst_params."""
    B, F = x.shape
    if tk is None:
        # Single step for F<=1024; 2 steps at the default fc_size=2048.
        tk = min(F, 1024)
    tk = min(tk, F)
    assert F % tk == 0, "fc_size must be divisible by the K tile"

    xb = x.astype(jnp.bfloat16)  # (B,F) cast is activation-sized; cheap per call

    out = pl.pallas_call(
        netd_inst_kernel,
        out_shape=jax.ShapeDtypeStruct((B, NPAD), jnp.float32),
        grid_spec=pltpu.PrefetchScalarGridSpec(
            num_scalar_prefetch=0,
            grid=(F // tk,),
            in_specs=[
                pl.BlockSpec((B, tk), lambda k: (0, k)),                   # x  (streamed)
                pl.BlockSpec((tk, H1), lambda k: (k, 0)),                  # W1 (streamed)
                pl.BlockSpec((H1, H2), lambda k: (0, 0)),                  # W2 (resident)
                pl.BlockSpec((H2, NPAD), lambda k: (0, 0)),                # W3 (resident, padded)
                pl.BlockSpec((1, H1 + H2 + 2 * NPAD), lambda k: (0, 0)),   # packed b1|b2|gamma|beta
            ],
            out_specs=pl.BlockSpec((B, NPAD), lambda k: (0, 0)),
            scratch_shapes=[pltpu.VMEM((B, H1), jnp.float32)],
        ),
        compiler_params=pltpu.CompilerParams(
            dimension_semantics=("arbitrary",),
            vmem_limit_bytes=32 * 1024 * 1024,
        ),
    )(xb, prepped["w1"], prepped["w2"], prepped["w3"], prepped["packed"])
    return out[:, :2]


def reference_forward_fp32(x, params):
    """fp32 reference of the PyTorch module (training-mode BN, with b3)."""
    h1 = jnp.maximum(x @ params["w1"].T + params["b1"], 0.0)
    h2 = jnp.maximum(h1 @ params["w2"].T + params["b2"], 0.0)
    z = h2 @ params["w3"].T + params["b3"]
    mean = jnp.mean(z, axis=0, keepdims=True)
    var = jnp.mean((z - mean) ** 2, axis=0, keepdims=True)
    y = params["gamma"] * (z - mean) / jnp.sqrt(var + BN_EPS) + params["beta"]
    return jnp.maximum(y, 0.0)


def reference_forward_bf16(x, params):
    """Mirror of the kernel's numerics (bf16 operands, fp32 accum, b3 dropped)."""
    f32, bf16 = jnp.float32, jnp.bfloat16
    h1 = jnp.dot(x.astype(bf16), params["w1"].T.astype(bf16),
                 preferred_element_type=f32) + params["b1"]
    h1 = jnp.maximum(h1, 0.0)
    h2 = jnp.dot(h1.astype(bf16), params["w2"].T.astype(bf16),
                 preferred_element_type=f32) + params["b2"]
    h2 = jnp.maximum(h2, 0.0)
    z = jnp.dot(h2.astype(bf16), params["w3"].T.astype(bf16),
                preferred_element_type=f32)
    mean = jnp.mean(z, axis=0, keepdims=True)
    var = jnp.mean((z - mean) ** 2, axis=0, keepdims=True)
    y = params["gamma"] * (z - mean) * jax.lax.rsqrt(var + BN_EPS) + params["beta"]
    return jnp.maximum(y, 0.0)


if __name__ == "__main__":
    B = 16           # ROI batch (small demo; production should use >=128-256 ROIs/call)
    FC_SIZE = 512    # small stand-in for the default fc_size=2048

    key = jax.random.PRNGKey(0)
    ks = jax.random.split(key, 8)

    # Deterministic synthetic parameters (PyTorch shapes: Linear weight is (out, in)).
    params = {
        "w1": 0.05 * jax.random.normal(ks[0], (1024, FC_SIZE), jnp.float32),
        "b1": 0.01 * jax.random.normal(ks[1], (1024,), jnp.float32),
        "w2": 0.05 * jax.random.normal(ks[2], (256, 1024), jnp.float32),
        "b2": 0.01 * jax.random.normal(ks[3], (256,), jnp.float32),
        "w3": 0.05 * jax.random.normal(ks[4], (2, 256), jnp.float32),
        "b3": 0.01 * jax.random.normal(ks[5], (2,), jnp.float32),
        "gamma": jnp.ones((2,), jnp.float32),   # BatchNorm1d affine weight init
        "beta": jnp.zeros((2,), jnp.float32),   # BatchNorm1d affine bias init
    }
    x = jax.random.normal(ks[6], (B, FC_SIZE), jnp.float32)

    # One-time weight re-layout (hoisted out of the per-call path).
    prepped = jax.tree_util.tree_map(jax.block_until_ready,
                                     prepare_netd_inst_params(params))

    out = jax.block_until_ready(netd_inst_forward(x, prepped))
    assert out.shape == (B, 2)

    # Tight check against a reference that mirrors the kernel's bf16/fp32 numerics.
    ref_mirror = reference_forward_bf16(x, params)
    assert jnp.allclose(out, ref_mirror, atol=5e-3, rtol=5e-3), (
        f"mirror mismatch: max abs err {jnp.max(jnp.abs(out - ref_mirror))}")

    # Loose sanity check against the module's full-fp32 semantics (bf16 weight
    # quantization is the only source of drift; outputs are O(1) after BN).
    ref_fp32 = reference_forward_fp32(x, params)
    assert jnp.allclose(out, ref_fp32, atol=1.5e-1, rtol=1.5e-1), (
        f"fp32 drift too large: max abs err {jnp.max(jnp.abs(out - ref_fp32))}")

    print("KERNEL_OK")
</pallas_src>

<mosaic_0001>
module attributes {stable_mosaic.version = 11 : i64} {
  func.func @netd_inst_kernel(%arg0: i32, %arg1: memref<16x512xbf16, #tpu.memory_space<vmem>>, %arg2: memref<512x1024xbf16, #tpu.memory_space<vmem>>, %arg3: memref<1024x256xbf16, #tpu.memory_space<vmem>>, %arg4: memref<256x128xbf16, #tpu.memory_space<vmem>>, %arg5: memref<1x1536xf32, #tpu.memory_space<vmem>>, %arg6: memref<16x128xf32, #tpu.memory_space<vmem>>, %arg7: memref<16x1024xf32, #tpu.memory_space<vmem>>) attributes {dimension_semantics = [#tpu.dimension_semantics<arbitrary>], iteration_bounds = array<i64: 1>, scalar_prefetch = 0 : i64, scratch_operands = 1 : i64, tpu.core_type = #tpu.core_type<tc>, window_params = [{transform_indices = @transform_0, window_bounds = array<i64: 16, 512>}, {transform_indices = @transform_1, window_bounds = array<i64: 512, 1024>}, {pipeline_mode = #tpu.pipeline_mode<synchronous>, transform_indices = @transform_2, window_bounds = array<i64: 1024, 256>}, {pipeline_mode = #tpu.pipeline_mode<synchronous>, transform_indices = @transform_3, window_bounds = array<i64: 256, 128>}, {pipeline_mode = #tpu.pipeline_mode<synchronous>, transform_indices = @transform_4, window_bounds = array<i64: 1, 1536>}, {pipeline_mode = #tpu.pipeline_mode<synchronous>, transform_indices = @transform_5, window_bounds = array<i64: 16, 128>}]} {
    %c0 = arith.constant 0 : index
    %c0_0 = arith.constant 0 : index
    %0 = vector.load %arg1[%c0, %c0_0] : memref<16x512xbf16, #tpu.memory_space<vmem>>, vector<16x512xbf16>
    %c0_1 = arith.constant 0 : index
    %c0_2 = arith.constant 0 : index
    %1 = vector.load %arg2[%c0_1, %c0_2] : memref<512x1024xbf16, #tpu.memory_space<vmem>>, vector<512x1024xbf16>
    %cst = arith.constant dense<0.000000e+00> : vector<16x1024xf32>
    %2 = tpu.matmul %0, %1, %cst {dimension_numbers = #tpu.dot_dimension_numbers<[1], [0], [0], [1], [0, 0, 1, 1], [], []>} : vector<16x512xbf16>, vector<512x1024xbf16>, vector<16x1024xf32> -> vector<16x1024xf32>
    %c0_i32 = arith.constant 0 : i32
    %3 = arith.cmpi eq, %arg0, %c0_i32 : i32
    %4 = arith.extui %3 : i1 to i32
    %c0_i32_3 = arith.constant 0 : i32
    %5 = arith.cmpi ne, %4, %c0_i32_3 : i32
    scf.if %5 {
      %c0_8 = arith.constant 0 : index
      %c0_9 = arith.constant 0 : index
      %12 = vector.load %arg5[%c0_8, %c0_9] : memref<1x1536xf32, #tpu.memory_space<vmem>>, vector<1x1024xf32>
      %13 = vector.broadcast %12 : vector<1x1024xf32> to vector<16x1024xf32>
      %14 = arith.addf %2, %13 : vector<16x1024xf32>
      %c0_10 = arith.constant 0 : index
      %c0_11 = arith.constant 0 : index
      %15 = vector.load %arg7[%c0_10, %c0_11] : memref<16x1024xf32, #tpu.memory_space<vmem>>, vector<16x1024xf32>
      tpu.vector_store %arg7[%c0_10, %c0_11], %14 {strides = array<i32>} : memref<16x1024xf32, #tpu.memory_space<vmem>>, vector<16x1024xf32>,
    } else {
    }
    %c0_i32_4 = arith.constant 0 : i32
    %6 = arith.cmpi sgt, %arg0, %c0_i32_4 : i32
    %7 = arith.extui %6 : i1 to i32
    %c0_i32_5 = arith.constant 0 : i32
    %8 = arith.cmpi ne, %7, %c0_i32_5 : i32
    scf.if %8 {
      %c0_8 = arith.constant 0 : index
      %c0_9 = arith.constant 0 : index
      %12 = vector.load %arg7[%c0_8, %c0_9] : memref<16x1024xf32, #tpu.memory_space<vmem>>, vector<16x1024xf32>
      %13 = arith.addf %12, %2 : vector<16x1024xf32>
      %c0_10 = arith.constant 0 : index
      %c0_11 = arith.constant 0 : index
      %14 = vector.load %arg7[%c0_10, %c0_11] : memref<16x1024xf32, #tpu.memory_space<vmem>>, vector<16x1024xf32>
      tpu.vector_store %arg7[%c0_10, %c0_11], %13 {strides = array<i32>} : memref<16x1024xf32, #tpu.memory_space<vmem>>, vector<16x1024xf32>,
    } else {
    }
    %c0_i32_6 = arith.constant 0 : i32
    %9 = arith.cmpi eq, %arg0, %c0_i32_6 : i32
    %10 = arith.extui %9 : i1 to i32
    %c0_i32_7 = arith.constant 0 : i32
    %11 = arith.cmpi ne, %10, %c0_i32_7 : i32
    scf.if %11 {
      %c0_8 = arith.constant 0 : index
      %c1024 = arith.constant 1024 : index
      %12 = vector.load %arg5[%c0_8, %c1024] : memref<1x1536xf32, #tpu.memory_space<vmem>>, vector<1x256xf32>
      %c0_9 = arith.constant 0 : index
      %c1280 = arith.constant 1280 : index
      %13 = vector.load %arg5[%c0_9, %c1280] : memref<1x1536xf32, #tpu.memory_space<vmem>>, vector<1x128xf32>
      %c0_10 = arith.constant 0 : index
      %c1408 = arith.constant 1408 : index
      %14 = vector.load %arg5[%c0_10, %c1408] : memref<1x1536xf32, #tpu.memory_space<vmem>>, vector<1x128xf32>
      %c0_11 = arith.constant 0 : index
      %c0_12 = arith.constant 0 : index
      %15 = vector.load %arg7[%c0_11, %c0_12] : memref<16x1024xf32, #tpu.memory_space<vmem>>, vector<16x1024xf32>
      %cst_13 = arith.constant 0.000000e+00 : f32
      %16 = vector.broadcast %cst_13 : f32 to vector<16x1024xf32>
      %17 = arith.maximumf %15, %16 : vector<16x1024xf32>
      %18 = arith.truncf %17 : vector<16x1024xf32> to vector<16x1024xbf16>
      %c0_14 = arith.constant 0 : index
      %c0_15 = arith.constant 0 : index
      %19 = vector.load %arg3[%c0_14, %c0_15] : memref<1024x256xbf16, #tpu.memory_space<vmem>>, vector<1024x256xbf16>
      %cst_16 = arith.constant dense<0.000000e+00> : vector<16x256xf32>
      %20 = tpu.matmul %18, %19, %cst_16 {dimension_numbers = #tpu.dot_dimension_numbers<[1], [0], [0], [1], [0, 0, 1, 1], [], []>} : vector<16x1024xbf16>, vector<1024x256xbf16>, vector<16x256xf32> -> vector<16x256xf32>
      %21 = vector.broadcast %12 : vector<1x256xf32> to vector<16x256xf32>
      %22 = arith.addf %20, %21 : vector<16x256xf32>
      %cst_17 = arith.constant 0.000000e+00 : f32
      %23 = vector.broadcast %cst_17 : f32 to vector<16x256xf32>
      %24 = arith.maximumf %22, %23 : vector<16x256xf32>
      %25 = arith.truncf %24 : vector<16x256xf32> to vector<16x256xbf16>
      %c0_18 = arith.constant 0 : index
      %c0_19 = arith.constant 0 : index
      %26 = vector.load %arg4[%c0_18, %c0_19] : memref<256x128xbf16, #tpu.memory_space<vmem>>, vector<256x128xbf16>
      %cst_20 = arith.constant dense<0.000000e+00> : vector<16x128xf32>
      %27 = tpu.matmul %25, %26, %cst_20 {dimension_numbers = #tpu.dot_dimension_numbers<[1], [0], [0], [1], [0, 0, 1, 1], [], []>} : vector<16x256xbf16>, vector<256x128xbf16>, vector<16x128xf32> -> vector<16x128xf32>
      %cst_21 = arith.constant dense<0.000000e+00> : vector<128xf32>
      %28 = vector.multi_reduction <add>, %27, %cst_21 [0] : vector<16x128xf32> to vector<128xf32>
      %29 = vector.shape_cast %28 : vector<128xf32> to vector<1x128xf32>
      %cst_22 = arith.constant 1.600000e+01 : f32
      %30 = vector.broadcast %cst_22 : f32 to vector<1x128xf32>
      %31 = arith.divf %29, %30 : vector<1x128xf32>
      %32 = vector.broadcast %31 : vector<1x128xf32> to vector<16x128xf32>
      %33 = arith.subf %27, %32 : vector<16x128xf32>
      %34 = vector.broadcast %31 : vector<1x128xf32> to vector<16x128xf32>
      %35 = arith.subf %27, %34 : vector<16x128xf32>
      %36 = arith.mulf %33, %35 : vector<16x128xf32>
      %cst_23 = arith.constant dense<0.000000e+00> : vector<128xf32>
      %37 = vector.multi_reduction <add>, %36, %cst_23 [0] : vector<16x128xf32> to vector<128xf32>
      %38 = vector.shape_cast %37 : vector<128xf32> to vector<1x128xf32>
      %cst_24 = arith.constant 1.600000e+01 : f32
      %39 = vector.broadcast %cst_24 : f32 to vector<1x128xf32>
      %40 = arith.divf %38, %39 : vector<1x128xf32>
      %41 = vector.broadcast %31 : vector<1x128xf32> to vector<16x128xf32>
      %42 = arith.subf %27, %41 : vector<16x128xf32>
      %cst_25 = arith.constant 9.99999974E-6 : f32
      %43 = vector.broadcast %cst_25 : f32 to vector<1x128xf32>
      %44 = arith.addf %40, %43 : vector<1x128xf32>
      %45 = math.rsqrt %44 : vector<1x128xf32>
      %46 = vector.broadcast %45 : vector<1x128xf32> to vector<16x128xf32>
      %47 = arith.mulf %42, %46 : vector<16x128xf32>
      %48 = vector.broadcast %13 : vector<1x128xf32> to vector<16x128xf32>
      %49 = arith.mulf %48, %47 : vector<16x128xf32>
      %50 = vector.broadcast %14 : vector<1x128xf32> to vector<16x128xf32>
      %51 = arith.addf %49, %50 : vector<16x128xf32>
      %cst_26 = arith.constant 0.000000e+00 : f32
      %52 = vector.broadcast %cst_26 : f32 to vector<16x128xf32>
      %53 = arith.maximumf %51, %52 : vector<16x128xf32>
      %c0_27 = arith.constant 0 : index
      %c0_28 = arith.constant 0 : index
      %54 = vector.load %arg6[%c0_27, %c0_28] : memref<16x128xf32, #tpu.memory_space<vmem>>, vector<16x128xf32>
      tpu.vector_store %arg6[%c0_27, %c0_28], %53 {strides = array<i32>} : memref<16x128xf32, #tpu.memory_space<vmem>>, vector<16x128xf32>,
    } else {
    }
    return
  }
  func.func @transform_0(%arg0: i32) -> (i32, i32) {
    %c0_i32 = arith.constant 0 : i32
    %c0_i32_0 = arith.constant 0 : i32
    return %c0_i32, %arg0 : i32, i32
  }
  func.func @transform_1(%arg0: i32) -> (i32, i32) {
    %c0_i32 = arith.constant 0 : i32
    %c0_i32_0 = arith.constant 0 : i32
    return %arg0, %c0_i32 : i32, i32
  }
  func.func @transform_2(%arg0: i32) -> (i32, i32) {
    %c0_i32 = arith.constant 0 : i32
    %c0_i32_0 = arith.constant 0 : i32
    %c0_i32_1 = arith.constant 0 : i32
    return %c0_i32, %c0_i32_0 : i32, i32
  }
  func.func @transform_3(%arg0: i32) -> (i32, i32) {
    %c0_i32 = arith.constant 0 : i32
    %c0_i32_0 = arith.constant 0 : i32
    %c0_i32_1 = arith.constant 0 : i32
    return %c0_i32, %c0_i32_0 : i32, i32
  }
  func.func @transform_4(%arg0: i32) -> (i32, i32) {
    %c0_i32 = arith.constant 0 : i32
    %c0_i32_0 = arith.constant 0 : i32
    %c0_i32_1 = arith.constant 0 : i32
    return %c0_i32, %c0_i32_0 : i32, i32
  }
  func.func @transform_5(%arg0: i32) -> (i32, i32) {
    %c0_i32 = arith.constant 0 : i32
    %c0_i32_0 = arith.constant 0 : i32
    %c0_i32_1 = arith.constant 0 : i32
    return %c0_i32, %c0_i32_0 : i32, i32
  }
}

</mosaic_0001>

<bundles_post_ra>
// kernel: tpu_custom_call.1
= control target key start
LH: loop header
LB: loop body
LE: loop exit
PB: predicated region body
PF: predicated region fallthrough
CT: control target
= control target key end

     0   :  { %10 = vsyncpa [#allocation4], 0  ;;  %s4332_s0 = inlined_call_operand.hbm [shape: bf16[16,512], index: 0, kind: input, shape index: {}]   ;;  %s4333_s1 = inlined_call_operand.hbm [shape: bf16[512,1024], index: 1, kind: input, shape index: {}]   ;;  %s4334_s2 = inlined_call_operand.hbm [shape: bf16[1024,256], index: 2, kind: input, shape index: {}]   ;;  %s4335_s3 = inlined_call_operand.hbm [shape: bf16[256,128], index: 3, kind: input, shape index: {}]   ;;  %s4336_s4 = inlined_call_operand.vmem [shape: f32[1,1536], index: 4, kind: input, shape index: {}]   ;;  %s4337_s5 = inlined_call_operand.hbm [shape: f32[16,128], index: 5, kind: output, shape index: {}]  }
   0x1   :  { %11 = vsyncpa [#allocation7], 0 }
   0x2   :  { %12 = vsyncpa [#allocation10], 0 }
   0x3   :  { %13 = vsyncpa [#allocation5], 0  ;;  %s4158_s18 = smov [#allocation6]   ;;  %s4040_s22 = scalar_lea.hbm %s4333_s1, 32768 }
   0x4   :  { %s31_s19 = sshll.u32 %s4158_s18, 4  ;;  %p4041_p0 = scmp.ne.s32.totalorder %s4333_s1, %s4040_s22  ;;  %s32_s19 = int_to_ptr.vmem [resolvable:$true] %s31_s19 }
   0x5   :  { %p4044_p1 = scmp.lt.u32.totalorder %s4040_s22, %s4333_s1 }
   0x7   :  { %p4046_p2 = pnand %p4044_p1, %p4041_p0 }
   0x9   :  { %4049 = shalt.err (!%p4046_p2)
}
   0xa   :  { %s4050_s27 = scalar_lea.vmem %s32_s19, 32768  ;;  %p4055_p4 = scmp.lt.s32.totalorder %s32_s19, %s32_s19 }
   0xb   :  { %p4051_p3 = scmp.ne.s32.totalorder %s32_s19, %s4050_s27  ;;  %p4056_p5 = scmp.lt.s32.totalorder %s4050_s27, %s4050_s27 }
   0xd   :  { %p4057_p6 = por %p4056_p5, %p4055_p4 }
   0xf   :  { %p4058_p7 = pnand %p4057_p6, %p4051_p3 }
  0x11   :  { %4061 = shalt.err (!%p4058_p7)
}
  0x12   :  { %s4159_s28 = smov 512   ;;  %s4160_s29 = smov 32  }
  0x13   :  { %37 = dma.hbm_to_vmem [thread:$0]  %s4333_s1, 32768, %s32_s19, [#allocation7], %s4159_s28, %s4159_s28, %s4160_s29  }
  0x14   :  { %s4161_s7 = smov [#allocation3]   ;;  %s4062_s11 = scalar_lea.hbm %s4332_s0, 512 }
  0x15   :  { %s19_s8 = sshll.u32 %s4161_s7, 4  ;;  %p4063_p8 = scmp.ne.s32.totalorder %s4332_s0, %s4062_s11  ;;  %s20_s8 = int_to_ptr.vmem [resolvable:$true] %s19_s8 }
  0x16   :  { %p4066_p9 = scmp.lt.u32.totalorder %s4062_s11, %s4332_s0 }
  0x18   :  { %p4068_p10 = pnand %p4066_p9, %p4063_p8 }
  0x1a   :  { %4071 = shalt.err (!%p4068_p10)
}
  0x1b   :  { %s4072_s16 = scalar_lea.vmem %s20_s8, 512  ;;  %p4077_p12 = scmp.lt.s32.totalorder %s20_s8, %s20_s8 }
  0x1c   :  { %p4073_p11 = scmp.ne.s32.totalorder %s20_s8, %s4072_s16  ;;  %p4078_p13 = scmp.lt.s32.totalorder %s4072_s16, %s4072_s16 }
  0x1e   :  { %p4079_p0 = por %p4078_p13, %p4077_p12 }
  0x20   :  { %p4080_p1 = pnand %p4079_p0, %p4073_p11 }
  0x22   :  { %4083 = shalt.err (!%p4080_p1)
}
  0x23   :  { %s4162_s1 = smov 256   ;;  %s4163_s17 = smov 16  }
  0x24   :  { %25 = dma.hbm_to_vmem [thread:$0]  %s4332_s0, 512, %s20_s8, [#allocation4], %s4162_s1, %s4162_s1, %s4163_s17  }
  0x25   :  { %s4164_s20 = smov [#allocation8]   ;;  %s4084_s24 = scalar_lea.hbm %s4334_s2, 16384 }
  0x26   :  { %s43_s21 = sshll.u32 %s4164_s20, 4  ;;  %p4085_p2 = scmp.ne.s32.totalorder %s4334_s2, %s4084_s24  ;;  %s44_s21 = int_to_ptr.vmem [resolvable:$true] %s43_s21 }
  0x27   :  { %p4088_p3 = scmp.lt.u32.totalorder %s4084_s24, %s4334_s2 }
  0x29   :  { %p4090_p4 = pnand %p4088_p3, %p4085_p2 }
  0x2b   :  { %4093 = shalt.err (!%p4090_p4)
}
  0x2c   :  { %s4094_s29 = scalar_lea.vmem %s44_s21, 16384  ;;  %p4099_p6 = scmp.lt.s32.totalorder %s44_s21, %s44_s21 }
  0x2d   :  { %p4095_p5 = scmp.ne.s32.totalorder %s44_s21, %s4094_s29  ;;  %p4100_p7 = scmp.lt.s32.totalorder %s4094_s29, %s4094_s29 }
  0x2f   :  { %p4101_p8 = por %p4100_p7, %p4099_p6 }
  0x31   :  { %p4102_p9 = pnand %p4101_p8, %p4095_p5 }
  0x33   :  { %4105 = shalt.err (!%p4102_p9)
}
  0x34   :  { %s4165_s0 = smov 128   ;;  %s4166_s30 = smov 8  }
  0x35   :  { %49 = dma.hbm_to_vmem [thread:$0]  %s4334_s2, 16384, %s44_s21, [#allocation7], %s4165_s0, %s4165_s0, %s4166_s30  }
  0x36   :  { %s4167_s8 = smov [#allocation9]   ;;  %s4106_s12 = scalar_lea.hbm %s4335_s3, 2048 }
  0x37   :  { %s55_s9 = sshll.u32 %s4167_s8, 4  ;;  %p4107_p10 = scmp.ne.s32.totalorder %s4335_s3, %s4106_s12  ;;  %s56_s9 = int_to_ptr.vmem [resolvable:$true] %s55_s9 }
  0x38   :  { %p4110_p11 = scmp.lt.u32.totalorder %s4106_s12, %s4335_s3 }
  0x3a   :  { %p4112_p12 = pnand %p4110_p11, %p4107_p10 }
  0x3c   :  { %4115 = shalt.err (!%p4112_p12)
}
  0x3d   :  { %s4116_s1 = scalar_lea.vmem %s56_s9, 2048  ;;  %p4121_p0 = scmp.lt.s32.totalorder %s56_s9, %s56_s9 }
  0x3e   :  { %p4117_p13 = scmp.ne.s32.totalorder %s56_s9, %s4116_s1  ;;  %p4122_p1 = scmp.lt.s32.totalorder %s4116_s1, %s4116_s1 }
  0x40   :  { %p4123_p2 = por %p4122_p1, %p4121_p0 }
  0x42   :  { %p4124_p3 = pnand %p4123_p2, %p4117_p13 }
  0x44   :  { %4127 = shalt.err (!%p4124_p3)
}
  0x45   :  { %s4168_s2 = smov 64   ;;  %s4169_s17 = smov 4  }
  0x46   :  { %61 = dma.hbm_to_vmem [thread:$0]  %s4335_s3, 2048, %s56_s9, [#allocation10], %s4168_s2, %s4168_s2, %s4169_s17  }
  0x47   :  { %4150 = dma.done.wait [#allocation4], 512  }
  0x48   :  { %4151 = vsyncadd [#allocation4], 4294966784 }
  0x49   :  { %4152 = dma.done.wait [#allocation7], 49152  }
  0x4a   :  { %4153 = vsyncadd [#allocation7], 4294918144 }
  0x4b   :  { %4154 = dma.done.wait [#allocation10], 2048  }
  0x4c   :  { %4155 = vsyncadd [#allocation10], 4294965248  ;;  %v81_v0 = vld [vmem:[#allocation6] sm:$0xff]  ;;  %v83_v30 = vld [vmem:[#allocation6 + $0x10] sm:$0xff]  ;;  %s4170_s27 = smov [#allocation11]  }
  0x4d   :  { %v85_v1 = vld [vmem:[#allocation6 + $0x20] sm:$0xff]  ;;  %v87_v32 = vld [vmem:[#allocation6 + $0x30] sm:$0xff]  ;;  %s3333_s28 = sshll.u32 %s4170_s27, 4  ;;  %s3334_s28 = int_to_ptr.vmem [resolvable:$true] %s3333_s28 }
  0x4e   :  { %v89_v2 = vld [vmem:[#allocation6 + $0x40] sm:$0xff]  ;;  %v3352_v3 = vcombine.high %v81_v0, %v85_v1  ;;  %v3351_v4 = vcombine.low %v81_v0, %v85_v1  ;;  %v3356_v34 = vcombine.high %v83_v30, %v87_v32  ;;  %v3355_v35 = vcombine.low %v83_v30, %v87_v32  ;;  %v91_v36 = vld [vmem:[#allocation6 + $0x50] sm:$0xff]  ;;  %s4128_s29 = scalar_lea.vmem %s3334_s28, 256  ;;  %p4133_p5 = scmp.lt.s32.totalorder %s3334_s28, %s3334_s28 }
  0x4f   :  { %v93_v5 = vld [vmem:[#allocation6 + $0x60] sm:$0xff]  ;;  %v95_v37 = vld [vmem:[#allocation6 + $0x70] sm:$0xff]  ;;  %p4129_p4 = scmp.ne.s32.totalorder %s3334_s28, %s4128_s29  ;;  %p4134_p6 = scmp.lt.s32.totalorder %s4128_s29, %s4128_s29 }
  0x50   :  { %v3360_v6 = vcombine.high %v89_v2, %v93_v5  ;;  %v97_v7 = vld [vmem:[#allocation6 + $0x80] sm:$0xff]  ;;  %1637 = vmatprep.subr.bf16.mxu1 %v3352_v3  ;;  %v3359_v9 = vcombine.low %v89_v2, %v93_v5  ;;  %v3364_v40 = vcombine.high %v91_v36, %v95_v37  ;;  %v99_v41 = vld [vmem:[#allocation6 + $0x90] sm:$0xff]  ;;  %1809 = vmatprep.subr.bf16.mxu0 %v3356_v34 }
  0x51   :  { %v101_v8 = vld [vmem:[#allocation6 + $0xa0] sm:$0xff]  ;;  %1638 = vmatpush1.bf16.msra.mxu1 %v3351_v4  ;;  %v103_v42 = vld [vmem:[#allocation6 + $0xb0] sm:$0xff]  ;;  %1810 = vmatpush1.bf16.msra.mxu0 %v3355_v35  ;;  %v3363_v44 = vcombine.low %v91_v36, %v95_v37  ;;  %p4135_p7 = por %p4134_p6, %p4133_p5 }
  0x52   :  { %1639 = vmatprep.subr.bf16.mxu1 %v3360_v6  ;;  %v3368_v10 = vcombine.high %v97_v7, %v101_v8  ;;  %v105_v11 = vld [vmem:[#allocation6 + $0xc0] sm:$0xff]  ;;  %v3367_v13 = vcombine.low %v97_v7, %v101_v8  ;;  %1811 = vmatprep.subr.bf16.mxu0 %v3364_v40  ;;  %v3372_v47 = vcombine.high %v99_v41, %v103_v42  ;;  %v107_v49 = vld [vmem:[#allocation6 + $0xd0] sm:$0xff] }
  0x53   :  { %v109_v12 = vld [vmem:[#allocation6 + $0xe0] sm:$0xff]  ;;  %v111_v50 = vld [vmem:[#allocation6 + $0xf0] sm:$0xff]  ;;  %v3371_v52 = vcombine.low %v99_v41, %v103_v42  ;;  %p4136_p8 = pnand %p4135_p7, %p4129_p4 }
  0x54   :  { %v3376_v14 = vcombine.high %v105_v11, %v109_v12  ;;  %v113_v15 = vld [vmem:[#allocation6 + $0x100] sm:$0xff]  ;;  %v3375_v18 = vcombine.low %v105_v11, %v109_v12  ;;  %v3380_v55 = vcombine.high %v107_v49, %v111_v50  ;;  %v115_v57 = vld [vmem:[#allocation6 + $0x110] sm:$0xff]  ;;  %v3379_v62 = vcombine.low %v107_v49, %v111_v50 }
  0x55   :  { %1640 = vmatpush1.bf16.msra.mxu1 %v3359_v9  ;;  %v117_v16 = vld [vmem:[#allocation6 + $0x120] sm:$0xff]  ;;  %1812 = vmatpush1.bf16.msra.mxu0 %v3363_v44  ;;  %v119_v58 = vld [vmem:[#allocation6 + $0x130] sm:$0xff] }
  0x56   :  { %1641 = vmatprep.subr.bf16.mxu1 %v3368_v10  ;;  %v3820_v17 = vld [vmem:[#allocation3 + $0x4] ss:$16 sps:$4 sm:$0xff]   ;;  %v3384_v19 = vcombine.high %v113_v15, %v117_v16  ;;  %v3383_v22 = vcombine.low %v113_v15, %v117_v16  ;;  %1813 = vmatprep.subr.bf16.mxu0 %v3372_v47  ;;  %v3388_v1 = vcombine.high %v115_v57, %v119_v58 }
  0x57   :  { %1669 = vmatprep.mubr.bf16.mxu1 %v3820_v17  ;;  %v121_v20 = vld [vmem:[#allocation6 + $0x140] sm:$0xff]  ;;  %1841 = vmatprep.mubr.bf16.mxu0 %v3820_v17  ;;  %v123_v63 = vld [vmem:[#allocation6 + $0x150] sm:$0xff]  ;;  %v3387_v6 = vcombine.low %v115_v57, %v119_v58 }
  0x58   :  { %v125_v21 = vld [vmem:[#allocation6 + $0x160] sm:$0xff]  ;;  %v127_v2 = vld [vmem:[#allocation6 + $0x170] sm:$0xff] }
  0x59   :  { %1642 = vmatpush1.bf16.msra.mxu1 %v3367_v13  ;;  %v3392_v23 = vcombine.high %v121_v20, %v125_v21  ;;  %v129_v24 = vld [vmem:[#allocation6 + $0x180] sm:$0xff]  ;;  %v3391_v26 = vcombine.low %v121_v20, %v125_v21  ;;  %1814 = vmatpush1.bf16.msra.mxu0 %v3371_v52  ;;  %v131_v7 = vld [vmem:[#allocation6 + $0x190] sm:$0xff]  ;;  %v3396_v10 = vcombine.high %v123_v63, %v127_v2 }
  0x5a   :  { %1643 = vmatprep.subr.bf16.mxu1 %v3376_v14  ;;  %v133_v25 = vld [vmem:[#allocation6 + $0x1a0] sm:$0xff]  ;;  %1815 = vmatprep.subr.bf16.mxu0 %v3380_v55  ;;  %v135_v8 = vld [vmem:[#allocation6 + $0x1b0] sm:$0xff]  ;;  %v3395_v14 = vcombine.low %v123_v63, %v127_v2  ;;  %v4254_v55 = vld [vmem:[#allocation3 + $0xc] ss:$16 sps:$4 sm:$0xff]  }
  0x5b   :  { %v3400_v27 = vcombine.high %v129_v24, %v133_v25  ;;  %v137_v28 = vld [vmem:[#allocation6 + $0x1c0] sm:$0xff]  ;;  %v3399_v31 = vcombine.low %v129_v24, %v133_v25  ;;  %v139_v15 = vld [vmem:[#allocation6 + $0x1d0] sm:$0xff] }
  0x5c   :  { %v141_v29 = vld [vmem:[#allocation6 + $0x1e0] sm:$0xff]  ;;  %v143_v16 = vld [vmem:[#allocation6 + $0x1f0] sm:$0xff] }
  0x5d   :  { %1644 = vmatpush1.bf16.msra.mxu1 %v3375_v18  ;;  %v3408_v33 = vcombine.high %v137_v28, %v141_v29  ;;  %v145_v38 = vld [vmem:[#allocation6 + $0x200] sm:$0xff]  ;;  %v3407_v43 = vcombine.low %v137_v28, %v141_v29  ;;  %1816 = vmatpush1.bf16.msra.mxu0 %v3379_v62  ;;  %v3404_v18 = vcombine.high %v131_v7, %v135_v8  ;;  %v151_v24 = vld [vmem:[#allocation6 + $0x230] sm:$0xff] }
  0x5e   :  { %1645 = vmatprep.subr.bf16.mxu1 %v3384_v19  ;;  %v149_v39 = vld [vmem:[#allocation6 + $0x220] sm:$0xff]  ;;  %1817 = vmatprep.subr.bf16.mxu0 %v3388_v1  ;;  %v3411_v30 = vcombine.low %v139_v15, %v143_v16  ;;  %v159_v32 = vld [vmem:[#allocation6 + $0x270] sm:$0xff] }
  0x5f   :  { %v3416_v45 = vcombine.high %v145_v38, %v149_v39  ;;  %v153_v46 = vld [vmem:[#allocation6 + $0x240] sm:$0xff]  ;;  %v3415_v51 = vcombine.low %v145_v38, %v149_v39  ;;  %v163_v39 = vld [vmem:[#allocation6 + $0x290] sm:$0xff] }
  0x60   :  { %v157_v48 = vld [vmem:[#allocation6 + $0x260] sm:$0xff]  ;;  %v167_v40 = vld [vmem:[#allocation6 + $0x2b0] sm:$0xff] }
  0x61   :  { %1646 = vmatpush1.bf16.msra.mxu1 %v3383_v22  ;;  %v3424_v53 = vcombine.high %v153_v46, %v157_v48  ;;  %v161_v54 = vld [vmem:[#allocation6 + $0x280] sm:$0xff]  ;;  %v3423_v59 = vcombine.low %v153_v46, %v157_v48  ;;  %1818 = vmatpush1.bf16.msra.mxu0 %v3387_v6  ;;  %v3403_v22 = vcombine.low %v131_v7, %v135_v8  ;;  %v171_v50 = vld [vmem:[#allocation6 + $0x2d0] sm:$0xff] }
  0x62   :  { %1647 = vmatprep.subr.bf16.mxu1 %v3392_v23  ;;  %v165_v56 = vld [vmem:[#allocation6 + $0x2a0] sm:$0xff]  ;;  %1819 = vmatprep.subr.bf16.mxu0 %v3396_v10  ;;  %v147_v23 = vld [vmem:[#allocation6 + $0x210] sm:$0xff]  ;;  %v3436_v49 = vcombine.high %v163_v39, %v167_v40  ;;  %v3435_v57 = vcombine.low %v163_v39, %v167_v40 }
  0x63   :  { %v169_v60 = vld [vmem:[#allocation6 + $0x2c0] sm:$0xff]  ;;  %v3432_v0 = vcombine.high %v161_v54, %v165_v56  ;;  %v3431_v3 = vcombine.low %v161_v54, %v165_v56  ;;  %v3420_v34 = vcombine.high %v147_v23, %v151_v24  ;;  %v3419_v38 = vcombine.low %v147_v23, %v151_v24 }
  0x64   :  { %v173_v61 = vld [vmem:[#allocation6 + $0x2e0] sm:$0xff] }
  0x65   :  { %1648 = vmatpush1.bf16.msra.mxu1 %v3391_v26  ;;  %v177_v4 = vld [vmem:[#allocation6 + $0x300] sm:$0xff]  ;;  %v3440_v9 = vcombine.high %v169_v60, %v173_v61  ;;  %v3439_v11 = vcombine.low %v169_v60, %v173_v61  ;;  %1820 = vmatpush1.bf16.msra.mxu0 %v3395_v14  ;;  %v3412_v26 = vcombine.high %v139_v15, %v143_v16  ;;  %v183_v60 = vld [vmem:[#allocation6 + $0x330] sm:$0xff] }
  0x66   :  { %1649 = vmatprep.subr.bf16.mxu1 %v3400_v27  ;;  %v181_v5 = vld [vmem:[#allocation6 + $0x320] sm:$0xff]  ;;  %1821 = vmatprep.subr.bf16.mxu0 %v3404_v18 }
  0x67   :  { %v185_v12 = vld [vmem:[#allocation6 + $0x340] sm:$0xff]  ;;  %v3448_v17 = vcombine.high %v177_v4, %v181_v5  ;;  %v3447_v19 = vcombine.low %v177_v4, %v181_v5  ;;  %v191_v4 = vld [vmem:[#allocation6 + $0x370] sm:$0xff] }
  0x68   :  { %v189_v13 = vld [vmem:[#allocation6 + $0x360] sm:$0xff] }
  0x69   :  { %1650 = vmatpush1.bf16.msra.mxu1 %v3399_v31  ;;  %v193_v20 = vld [vmem:[#allocation6 + $0x380] sm:$0xff]  ;;  %v3456_v25 = vcombine.high %v185_v12, %v189_v13  ;;  %v3455_v27 = vcombine.low %v185_v12, %v189_v13  ;;  %1822 = vmatpush1.bf16.msra.mxu0 %v3403_v22  ;;  %v155_v31 = vld [vmem:[#allocation6 + $0x250] sm:$0xff] }
  0x6a   :  { %1651 = vmatprep.subr.bf16.mxu1 %v3408_v33  ;;  %v197_v21 = vld [vmem:[#allocation6 + $0x3a0] sm:$0xff]  ;;  %1823 = vmatprep.subr.bf16.mxu0 %v3412_v26  ;;  %v3428_v42 = vcombine.high %v155_v31, %v159_v32  ;;  %v3427_v46 = vcombine.low %v155_v31, %v159_v32  ;;  %v199_v12 = vld [vmem:[#allocation6 + $0x3b0] sm:$0xff] }
  0x6b   :  { %v201_v28 = vld [vmem:[#allocation6 + $0x3c0] sm:$0xff]  ;;  %v3464_v33 = vcombine.high %v193_v20, %v197_v21  ;;  %v3463_v35 = vcombine.low %v193_v20, %v197_v21  ;;  %v207_v20 = vld [vmem:[#allocation6 + $0x3f0] sm:$0xff] }
  0x6c   :  { %v205_v29 = vld [vmem:[#allocation6 + $0x3e0] sm:$0xff] }
  0x6d   :  { %1652 = vmatpush1.bf16.msra.mxu1 %v3407_v43  ;;  %v209_v36 = vld [vmem:[#allocation6 + $0x400] sm:$0xff]  ;;  %1824 = vmatpush1.bf16.msra.mxu0 %v3411_v30  ;;  %v3472_v41 = vcombine.high %v201_v28, %v205_v29  ;;  %v3471_v43 = vcombine.low %v201_v28, %v205_v29  ;;  %v215_v28 = vld [vmem:[#allocation6 + $0x430] sm:$0xff] }
  0x6e   :  { %1653 = vmatprep.subr.bf16.mxu1 %v3416_v45  ;;  %v213_v37 = vld [vmem:[#allocation6 + $0x420] sm:$0xff]  ;;  %1825 = vmatprep.subr.bf16.mxu0 %v3420_v34 }
  0x6f   :  { %v217_v44 = vld [vmem:[#allocation6 + $0x440] sm:$0xff]  ;;  %v3480_v47 = vcombine.high %v209_v36, %v213_v37  ;;  %v3479_v52 = vcombine.low %v209_v36, %v213_v37  ;;  %v223_v36 = vld [vmem:[#allocation6 + $0x470] sm:$0xff] }
  0x70   :  { %v221_v45 = vld [vmem:[#allocation6 + $0x460] sm:$0xff] }
  0x71   :  { %1654 = vmatpush1.bf16.msra.mxu1 %v3415_v51  ;;  %1826 = vmatpush1.bf16.msra.mxu0 %v3419_v38  ;;  %v4252_v48 = vld [vmem:[#allocation3] ss:$16 sps:$4 sm:$0xff]   ;;  %v3488_v56 = vcombine.high %v217_v44, %v221_v45  ;;  %v3487_v61 = vcombine.low %v217_v44, %v221_v45 }
  0x72   :  { %1655 = vmatprep.subr.bf16.mxu1 %v3424_v53  ;;  %1827 = vmatprep.subr.bf16.mxu0 %v3428_v42  ;;  %v175_v51 = vld [vmem:[#allocation6 + $0x2f0] sm:$0xff]  ;;  %v225_v53 = vld [vmem:[#allocation6 + $0x480] sm:$0xff] }
  0x73   :  { %v229_v54 = vld [vmem:[#allocation6 + $0x4a0] sm:$0xff]  ;;  %v3444_v58 = vcombine.high %v171_v50, %v175_v51  ;;  %v3443_v1 = vcombine.low %v171_v50, %v175_v51  ;;  %v231_v44 = vld [vmem:[#allocation6 + $0x4b0] sm:$0xff] }
  0x74   :  { %v233_v62 = vld [vmem:[#allocation6 + $0x4c0] sm:$0xff]  ;;  %v3495_v5 = vcombine.low %v225_v53, %v229_v54 }
  0x75   :  { %1656 = vmatpush1.bf16.msra.mxu1 %v3423_v59  ;;  %1828 = vmatpush1.bf16.msra.mxu0 %v3427_v46  ;;  %v179_v59 = vld [vmem:[#allocation6 + $0x310] sm:$0xff]  ;;  %v237_v63 = vld [vmem:[#allocation6 + $0x4e0] sm:$0xff] }
  0x76   :  { %1657 = vmatprep.subr.bf16.mxu1 %v3432_v0  ;;  %1829 = vmatprep.subr.bf16.mxu0 %v3436_v49  ;;  %v3496_v0 = vcombine.high %v225_v53, %v229_v54  ;;  %v3452_v2 = vcombine.high %v179_v59, %v183_v60  ;;  %v241_v6 = vld [vmem:[#allocation6 + $0x500] sm:$0xff]  ;;  %v3504_v8 = vcombine.high %v233_v62, %v237_v63  ;;  %v239_v53 = vld [vmem:[#allocation6 + $0x4f0] sm:$0xff] }
  0x77   :  { %v245_v7 = vld [vmem:[#allocation6 + $0x520] sm:$0xff]  ;;  %v3503_v13 = vcombine.low %v233_v62, %v237_v63  ;;  %v247_v62 = vld [vmem:[#allocation6 + $0x530] sm:$0xff] }
  0x78   :  { %v249_v14 = vld [vmem:[#allocation6 + $0x540] sm:$0xff]  ;;  %v3512_v16 = vcombine.high %v241_v6, %v245_v7  ;;  %v3511_v21 = vcombine.low %v241_v6, %v245_v7  ;;  %v255_v6 = vld [vmem:[#allocation6 + $0x570] sm:$0xff] }
  0x79   :  { %1658 = vmatpush1.bf16.msra.mxu1 %v3431_v3  ;;  %1830 = vmatpush1.bf16.msra.mxu0 %v3435_v57  ;;  %v187_v3 = vld [vmem:[#allocation6 + $0x350] sm:$0xff]  ;;  %v253_v15 = vld [vmem:[#allocation6 + $0x560] sm:$0xff] }
  0x7a   :  { %1659 = vmatprep.subr.bf16.mxu1 %v3440_v9  ;;  %1831 = vmatprep.subr.bf16.mxu0 %v3444_v58  ;;  %v3451_v9 = vcombine.low %v179_v59, %v183_v60  ;;  %v3460_v10 = vcombine.high %v187_v3, %v191_v4  ;;  %v257_v22 = vld [vmem:[#allocation6 + $0x580] sm:$0xff]  ;;  %v3520_v24 = vcombine.high %v249_v14, %v253_v15 }
  0x7b   :  { %v261_v23 = vld [vmem:[#allocation6 + $0x5a0] sm:$0xff]  ;;  %v3519_v29 = vcombine.low %v249_v14, %v253_v15  ;;  %v263_v14 = vld [vmem:[#allocation6 + $0x5b0] sm:$0xff] }
  0x7c   :  { %v265_v30 = vld [vmem:[#allocation6 + $0x5c0] sm:$0xff]  ;;  %v3528_v32 = vcombine.high %v257_v22, %v261_v23  ;;  %v3527_v37 = vcombine.low %v257_v22, %v261_v23  ;;  %v271_v22 = vld [vmem:[#allocation6 + $0x5f0] sm:$0xff] }
  0x7d   :  { %1660 = vmatpush1.bf16.msra.mxu1 %v3439_v11  ;;  %1832 = vmatpush1.bf16.msra.mxu0 %v3443_v1  ;;  %v195_v11 = vld [vmem:[#allocation6 + $0x390] sm:$0xff]  ;;  %v269_v31 = vld [vmem:[#allocation6 + $0x5e0] sm:$0xff] }
  0x7e   :  { %1661 = vmatprep.subr.bf16.mxu1 %v3448_v17  ;;  %1833 = vmatprep.subr.bf16.mxu0 %v3452_v2  ;;  %v3459_v17 = vcombine.low %v187_v3, %v191_v4  ;;  %v3468_v18 = vcombine.high %v195_v11, %v199_v12  ;;  %v273_v38 = vld [vmem:[#allocation6 + $0x600] sm:$0xff]  ;;  %v3536_v40 = vcombine.high %v265_v30, %v269_v31 }
  0x7f   :  { %v277_v39 = vld [vmem:[#allocation6 + $0x620] sm:$0xff]  ;;  %v3535_v45 = vcombine.low %v265_v30, %v269_v31  ;;  %v279_v30 = vld [vmem:[#allocation6 + $0x630] sm:$0xff] }
  0x80   :  { %v281_v46 = vld [vmem:[#allocation6 + $0x640] sm:$0xff]  ;;  %v3544_v49 = vcombine.high %v273_v38, %v277_v39  ;;  %v3543_v54 = vcombine.low %v273_v38, %v277_v39  ;;  %v287_v38 = vld [vmem:[#allocation6 + $0x670] sm:$0xff] }
  0x81   :  { %1662 = vmatpush1.bf16.msra.mxu1 %v3447_v19  ;;  %1834 = vmatpush1.bf16.msra.mxu0 %v3451_v9  ;;  %v203_v19 = vld [vmem:[#allocation6 + $0x3d0] sm:$0xff]  ;;  %v293_v57 = vld [vmem:[#allocation6 + $0x6a0] sm:$0xff] }
  0x82   :  { %1663 = vmatprep.subr.bf16.mxu1 %v3456_v25  ;;  %1835 = vmatprep.subr.bf16.mxu0 %v3460_v10  ;;  %v3467_v25 = vcombine.low %v195_v11, %v199_v12  ;;  %v3476_v26 = vcombine.high %v203_v19, %v207_v20  ;;  %v301_v1 = vld [vmem:[#allocation6 + $0x6e0] sm:$0xff] }
  0x83   :  { %v309_v9 = vld [vmem:[#allocation6 + $0x720] sm:$0xff] }
  0x85   :  { %1664 = vmatpush1.bf16.msra.mxu1 %v3455_v27  ;;  %1836 = vmatpush1.bf16.msra.mxu0 %v3459_v17  ;;  %v211_v27 = vld [vmem:[#allocation6 + $0x410] sm:$0xff]  ;;  %v317_v17 = vld [vmem:[#allocation6 + $0x760] sm:$0xff] }
  0x86   :  { %1665 = vmatprep.subr.bf16.mxu1 %v3464_v33  ;;  %1837 = vmatprep.subr.bf16.mxu0 %v3468_v18  ;;  %v3475_v33 = vcombine.low %v203_v19, %v207_v20  ;;  %v3484_v34 = vcombine.high %v211_v27, %v215_v28 }
  0x89   :  { %1666 = vmatpush1.bf16.msra.mxu1 %v3463_v35  ;;  %1838 = vmatpush1.bf16.msra.mxu0 %v3467_v25  ;;  %v219_v35 = vld [vmem:[#allocation6 + $0x450] sm:$0xff]  ;;  %v325_v25 = vld [vmem:[#allocation6 + $0x7a0] sm:$0xff] }
  0x8a   :  { %1667 = vmatprep.subr.bf16.mxu1 %v3472_v41  ;;  %1839 = vmatprep.subr.bf16.mxu0 %v3476_v26  ;;  %v3483_v41 = vcombine.low %v211_v27, %v215_v28  ;;  %v3492_v42 = vcombine.high %v219_v35, %v223_v36  ;;  %v3491_v50 = vcombine.low %v219_v35, %v223_v36  ;;  %v333_v35 = vld [vmem:[#allocation6 + $0x7e0] sm:$0xff] }
  0x8d   :  { %1668 = vmatpush1.bf16.msra.mxu1 %v3471_v43  ;;  %1840 = vmatpush1.bf16.msra.mxu0 %v3475_v33  ;;  %v227_v43 = vld [vmem:[#allocation6 + $0x490] sm:$0xff] }
  0x8e   :  { %1680 = vmatprep.subr.bf16.mxu1 %v3480_v47  ;;  %1852 = vmatprep.subr.bf16.mxu0 %v3484_v34  ;;  %v285_v47 = vld [vmem:[#allocation6 + $0x660] sm:$0xff]  ;;  %v3500_v51 = vcombine.high %v227_v43, %v231_v44  ;;  %v3499_v59 = vcombine.low %v227_v43, %v231_v44  ;;  %v86_v43 = vld [vmem:[#allocation6 + $0x28] sm:$0xff] }
  0x8f   :  { %v3552_v58 = vcombine.high %v281_v46, %v285_v47  ;;  %v3551_v63 = vcombine.low %v281_v46, %v285_v47  ;;  %v329_v34 = vld [vmem:[#allocation6 + $0x7c0] sm:$0xff]  ;;  %v295_v46 = vld [vmem:[#allocation6 + $0x6b0] sm:$0xff] }
  0x90   :  { %1670 = vmatmul.mubr.bf16.vlgmr.msra.gmra.mrb[0].mxu1 %v4252_v48  ;;  %1842 = vmatmul.mubr.bf16.vlgmr.msra.gmra.mrb[0].mxu0 %v4252_v48  ;;  %v3599_v47 = vcombine.low %v329_v34, %v333_v35 }
  0x91   :  { %1681 = vmatpush1.bf16.msra.mxu1 %v3479_v52  ;;  %1712 = vmatprep.mubr.bf16.mxu1 %v4254_v55  ;;  %v235_v52 = vld [vmem:[#allocation6 + $0x4d0] sm:$0xff] }
  0x92   :  { %1682 = vmatprep.subr.bf16.mxu1 %v3488_v56  ;;  %1853 = vmatpush1.bf16.msra.mxu0 %v3483_v41  ;;  %v289_v56 = vld [vmem:[#allocation6 + $0x680] sm:$0xff]  ;;  %v3508_v60 = vcombine.high %v235_v52, %v239_v53  ;;  %v3507_v3 = vcombine.low %v235_v52, %v239_v53  ;;  %v94_v52 = vld [vmem:[#allocation6 + $0x68] sm:$0xff] }
  0x93   :  { %1854 = vmatprep.subr.bf16.mxu0 %v3492_v42  ;;  %1884 = vmatprep.mubr.bf16.mxu0 %v4254_v55  ;;  %v3560_v2 = vcombine.high %v289_v56, %v293_v57  ;;  %v3559_v7 = vcombine.low %v289_v56, %v293_v57  ;;  %v82_v42 = vld [vmem:[#allocation6 + $0x8] sm:$0xff]  ;;  %v299_v56 = vld [vmem:[#allocation6 + $0x6d0] sm:$0xff] }
  0x94   :  { %v303_v57 = vld [vmem:[#allocation6 + $0x6f0] sm:$0xff] }
  0x95   :  { %1683 = vmatpush1.bf16.msra.mxu1 %v3487_v61  ;;  %v243_v61 = vld [vmem:[#allocation6 + $0x510] sm:$0xff] }
  0x96   :  { %1684 = vmatprep.subr.bf16.mxu1 %v3496_v0  ;;  %1855 = vmatpush1.bf16.msra.mxu0 %v3491_v50  ;;  %v297_v0 = vld [vmem:[#allocation6 + $0x6c0] sm:$0xff]  ;;  %v3516_v4 = vcombine.high %v243_v61, %v247_v62  ;;  %v3515_v11 = vcombine.low %v243_v61, %v247_v62  ;;  %v98_v61 = vld [vmem:[#allocation6 + $0x88] sm:$0xff] }
  0x97   :  { %1856 = vmatprep.subr.bf16.mxu0 %v3500_v51  ;;  %v3568_v10 = vcombine.high %v297_v0, %v301_v1  ;;  %v3567_v15 = vcombine.low %v297_v0, %v301_v1  ;;  %v90_v51 = vld [vmem:[#allocation6 + $0x48] sm:$0xff]  ;;  %v307_v0 = vld [vmem:[#allocation6 + $0x710] sm:$0xff] }
  0x98   :  { %v102_v62 = vld [vmem:[#allocation6 + $0xa8] sm:$0xff]  ;;  %v311_v1 = vld [vmem:[#allocation6 + $0x730] sm:$0xff] }
  0x99   :  { %1685 = vmatpush1.bf16.msra.mxu1 %v3495_v5  ;;  %v251_v5 = vld [vmem:[#allocation6 + $0x550] sm:$0xff] }
  0x9a   :  { %1686 = vmatprep.subr.bf16.mxu1 %v3504_v8  ;;  %1857 = vmatpush1.bf16.msra.mxu0 %v3499_v59  ;;  %v305_v8 = vld [vmem:[#allocation6 + $0x700] sm:$0xff]  ;;  %v3524_v12 = vcombine.high %v251_v5, %v255_v6  ;;  %v3523_v19 = vcombine.low %v251_v5, %v255_v6  ;;  %v3362_v59 = vcombine.high %v90_v51, %v94_v52  ;;  %v106_v6 = vld [vmem:[#allocation6 + $0xc8] sm:$0xff] }
  0x9b   :  { %1858 = vmatprep.subr.bf16.mxu0 %v3508_v60  ;;  %v3576_v18 = vcombine.high %v305_v8, %v309_v9  ;;  %v3575_v23 = vcombine.low %v305_v8, %v309_v9  ;;  %v3571_v5 = vcombine.low %v299_v56, %v303_v57  ;;  %v3580_v8 = vcombine.high %v307_v0, %v311_v1  ;;  %v315_v9 = vld [vmem:[#allocation6 + $0x750] sm:$0xff] }
  0x9d   :  { %1687 = vmatpush1.bf16.msra.mxu1 %v3503_v13  ;;  %v259_v13 = vld [vmem:[#allocation6 + $0x590] sm:$0xff] }
  0x9e   :  { %1688 = vmatprep.subr.bf16.mxu1 %v3512_v16  ;;  %1859 = vmatpush1.bf16.msra.mxu0 %v3507_v3  ;;  %v313_v16 = vld [vmem:[#allocation6 + $0x740] sm:$0xff]  ;;  %v3532_v20 = vcombine.high %v259_v13, %v263_v14  ;;  %v3531_v27 = vcombine.low %v259_v13, %v263_v14  ;;  %v3579_v13 = vcombine.low %v307_v0, %v311_v1  ;;  %v114_v14 = vld [vmem:[#allocation6 + $0x108] sm:$0xff] }
  0x9f   :  { %1860 = vmatprep.subr.bf16.mxu0 %v3516_v4  ;;  %v3584_v26 = vcombine.high %v313_v16, %v317_v17  ;;  %v3583_v31 = vcombine.low %v313_v16, %v317_v17  ;;  %v4263_v3 = vld [vmem:[#allocation3 + $0x4] ss:$16 sps:$4 sm:$0xff]   ;;  %v3370_v4 = vcombine.high %v98_v61, %v102_v62  ;;  %v178_v1 = vld [vmem:[#allocation6 + $0x308] sm:$0xff] }
  0xa0   :  { %v323_v17 = vld [vmem:[#allocation6 + $0x790] sm:$0xff] }
  0xa1   :  { %1689 = vmatpush1.bf16.msra.mxu1 %v3511_v21  ;;  %v267_v21 = vld [vmem:[#allocation6 + $0x5d0] sm:$0xff] }
  0xa2   :  { %1690 = vmatprep.subr.bf16.mxu1 %v3520_v24  ;;  %1861 = vmatpush1.bf16.msra.mxu0 %v3515_v11  ;;  %v321_v24 = vld [vmem:[#allocation6 + $0x780] sm:$0xff]  ;;  %v3540_v28 = vcombine.high %v267_v21, %v271_v22  ;;  %v3539_v33 = vcombine.low %v267_v21, %v271_v22  ;;  %v3369_v11 = vcombine.low %v98_v61, %v102_v62  ;;  %v122_v22 = vld [vmem:[#allocation6 + $0x148] sm:$0xff] }
  0xa3   :  { %1862 = vmatprep.subr.bf16.mxu0 %v3524_v12  ;;  %v3591_v39 = vcombine.low %v321_v24, %v325_v25  ;;  %v3834_v61 = vld [vmem:[#allocation8 + $0x24] ss:$8 sps:$4 sm:$0xff]  }
  0xa5   :  { %1691 = vmatpush1.bf16.msra.mxu1 %v3519_v29  ;;  %v275_v29 = vld [vmem:[#allocation6 + $0x610] sm:$0xff] }
  0xa6   :  { %1692 = vmatprep.subr.bf16.mxu1 %v3528_v32  ;;  %1863 = vmatpush1.bf16.msra.mxu0 %v3523_v19  ;;  %v3592_v32 = vcombine.high %v321_v24, %v325_v25  ;;  %v3548_v36 = vcombine.high %v275_v29, %v279_v30  ;;  %v3547_v41 = vcombine.low %v275_v29, %v279_v30  ;;  %v331_v25 = vld [vmem:[#allocation6 + $0x7d0] sm:$0xff]  ;;  %v130_v30 = vld [vmem:[#allocation6 + $0x188] sm:$0xff] }
  0xa7   :  { %1864 = vmatprep.subr.bf16.mxu0 %v3532_v20 }
  0xa9   :  { %1693 = vmatpush1.bf16.msra.mxu1 %v3527_v37  ;;  %v283_v37 = vld [vmem:[#allocation6 + $0x650] sm:$0xff] }
  0xaa   :  { %1694 = vmatprep.subr.bf16.mxu1 %v3536_v40  ;;  %1865 = vmatpush1.bf16.msra.mxu0 %v3531_v27  ;;  %v3600_v40 = vcombine.high %v329_v34, %v333_v35  ;;  %v3556_v44 = vcombine.high %v283_v37, %v287_v38  ;;  %v3555_v50 = vcombine.low %v283_v37, %v287_v38  ;;  %v142_v37 = vld [vmem:[#allocation6 + $0x1e8] sm:$0xff] }
  0xab   :  { %1866 = vmatprep.subr.bf16.mxu0 %v3540_v28 }
  0xad   :  { %1695 = vmatpush1.bf16.msra.mxu1 %v3535_v45  ;;  %v291_v45 = vld [vmem:[#allocation6 + $0x690] sm:$0xff] }
  0xae   :  { %1696 = vmatprep.subr.bf16.mxu1 %v3544_v49  ;;  %1867 = vmatpush1.bf16.msra.mxu0 %v3539_v33  ;;  %v3354_v49 = vcombine.high %v82_v42, %v86_v43  ;;  %v3564_v53 = vcombine.high %v291_v45, %v295_v46  ;;  %v3563_v60 = vcombine.low %v291_v45, %v295_v46  ;;  %v158_v45 = vld [vmem:[#allocation6 + $0x268] sm:$0xff] }
  0xaf   :  { %1868 = vmatprep.subr.bf16.mxu0 %v3548_v36  ;;  %v138_v36 = vld [vmem:[#allocation6 + $0x1c8] sm:$0xff] }
  0xb0   :  { %v3828_v46 = vld [vmem:[#allocation8 + $0x4] ss:$8 sps:$4 sm:$0xff]  }
  0xb1   :  { %1697 = vmatpush1.bf16.msra.mxu1 %v3543_v54  ;;  %v4260_v54 = vld [vmem:[#allocation3 + $0x8] ss:$16 sps:$4 sm:$0xff]  }
  0xb2   :  { %1698 = vmatprep.subr.bf16.mxu1 %v3552_v58  ;;  %1869 = vmatpush1.bf16.msra.mxu0 %v3547_v41  ;;  %v3353_v58 = vcombine.low %v82_v42, %v86_v43  ;;  %v150_v41 = vld [vmem:[#allocation6 + $0x228] sm:$0xff]  ;;  %v3409_v42 = vcombine.low %v138_v36, %v142_v37 }
  0xb3   :  { %1870 = vmatprep.subr.bf16.mxu0 %v3556_v44  ;;  %v154_v44 = vld [vmem:[#allocation6 + $0x248] sm:$0xff] }
  0xb5   :  { %1699 = vmatpush1.bf16.msra.mxu1 %v3551_v63  ;;  %v3572_v63 = vcombine.high %v299_v56, %v303_v57  ;;  %v3425_v56 = vcombine.low %v154_v44, %v158_v45  ;;  %v3829_v57 = vld [vmem:[#allocation8 + $0x10] ss:$8 sps:$4 sm:$0xff]  }
  0xb6   :  { %1700 = vmatprep.subr.bf16.mxu1 %v3560_v2  ;;  %1871 = vmatpush1.bf16.msra.mxu0 %v3555_v50  ;;  %v3361_v2 = vcombine.low %v90_v51, %v94_v52  ;;  %v3426_v50 = vcombine.high %v154_v44, %v158_v45  ;;  %v162_v51 = vld [vmem:[#allocation6 + $0x288] sm:$0xff] }
  0xb7   :  { %1872 = vmatprep.subr.bf16.mxu0 %v3564_v53  ;;  %v166_v52 = vld [vmem:[#allocation6 + $0x2a8] sm:$0xff]  ;;  %v3831_v53 = vld [vmem:[#allocation8 + $0x14] ss:$8 sps:$4 sm:$0xff]  }
  0xb8   :  { %v3433_v62 = vcombine.low %v162_v51, %v166_v52  ;;  %v234_v44 = vld [vmem:[#allocation6 + $0x4c8] sm:$0xff] }
  0xb9   :  { %1701 = vmatpush1.bf16.msra.mxu1 %v3559_v7  ;;  %v110_v7 = vld [vmem:[#allocation6 + $0xe8] sm:$0xff] }
  0xba   :  { %1702 = vmatprep.subr.bf16.mxu1 %v3568_v10  ;;  %1873 = vmatpush1.bf16.msra.mxu0 %v3563_v60  ;;  %v319_v10 = vld [vmem:[#allocation6 + $0x770] sm:$0xff]  ;;  %v3378_v12 = vcombine.high %v106_v6, %v110_v7  ;;  %v3377_v19 = vcombine.low %v106_v6, %v110_v7  ;;  %v174_v60 = vld [vmem:[#allocation6 + $0x2e8] sm:$0xff] }
  0xbb   :  { %1874 = vmatprep.subr.bf16.mxu0 %v3572_v63  ;;  %v3588_v16 = vcombine.high %v315_v9, %v319_v10  ;;  %v3587_v21 = vcombine.low %v315_v9, %v319_v10  ;;  %v3832_v63 = vld [vmem:[#allocation8 + $0x20] ss:$8 sps:$4 sm:$0xff]   ;;  %v3835_v6 = vld [vmem:[#allocation8 + $0x30] ss:$8 sps:$4 sm:$0xff]   ;;  %v3840_v10 = vld [vmem:[#allocation8 + $0x44] ss:$8 sps:$4 sm:$0xff]  }
  0xbc   :  { %v190_v9 = vld [vmem:[#allocation6 + $0x368] sm:$0xff] }
  0xbd   :  { %1703 = vmatpush1.bf16.msra.mxu1 %v3567_v15  ;;  %v118_v15 = vld [vmem:[#allocation6 + $0x128] sm:$0xff] }
  0xbe   :  { %1704 = vmatprep.subr.bf16.mxu1 %v3576_v18  ;;  %1875 = vmatpush1.bf16.msra.mxu0 %v3571_v5  ;;  %v327_v18 = vld [vmem:[#allocation6 + $0x7b0] sm:$0xff]  ;;  %v3386_v20 = vcombine.high %v114_v14, %v118_v15  ;;  %v3385_v27 = vcombine.low %v114_v14, %v118_v15  ;;  %v194_v14 = vld [vmem:[#allocation6 + $0x388] sm:$0xff] }
  0xbf   :  { %1876 = vmatprep.subr.bf16.mxu0 %v3580_v8  ;;  %v3596_v24 = vcombine.high %v323_v17, %v327_v18  ;;  %v3595_v29 = vcombine.low %v323_v17, %v327_v18  ;;  %v186_v8 = vld [vmem:[#allocation6 + $0x348] sm:$0xff]  ;;  %v3841_v18 = vld [vmem:[#allocation8 + $0x50] ss:$8 sps:$4 sm:$0xff]  }
  0xc0   :  { %v198_v15 = vld [vmem:[#allocation6 + $0x3a8] sm:$0xff]  ;;  %v3457_v17 = vcombine.low %v186_v8, %v190_v9 }
  0xc1   :  { %1705 = vmatpush1.bf16.msra.mxu1 %v3575_v23  ;;  %v126_v23 = vld [vmem:[#allocation6 + $0x168] sm:$0xff] }
  0xc2   :  { %1706 = vmatprep.subr.bf16.mxu1 %v3584_v26  ;;  %1877 = vmatpush1.bf16.msra.mxu0 %v3579_v13  ;;  %v335_v26 = vld [vmem:[#allocation6 + $0x7f0] sm:$0xff]  ;;  %v3394_v28 = vcombine.high %v122_v22, %v126_v23  ;;  %v3393_v33 = vcombine.low %v122_v22, %v126_v23  ;;  %v3458_v13 = vcombine.high %v186_v8, %v190_v9  ;;  %v3846_v22 = vld [vmem:[#allocation8 + $0x64] ss:$8 sps:$4 sm:$0xff]  }
  0xc3   :  { %1878 = vmatprep.subr.bf16.mxu0 %v3588_v16  ;;  %v3603_v35 = vcombine.low %v331_v25, %v335_v26  ;;  %v3843_v16 = vld [vmem:[#allocation8 + $0x54] ss:$8 sps:$4 sm:$0xff]   ;;  %v3465_v23 = vcombine.low %v194_v14, %v198_v15  ;;  %v238_v45 = vld [vmem:[#allocation6 + $0x4e8] sm:$0xff] }
  0xc4   :  { %v3870_v8 = vld [vmem:[#allocation8 + $0xe4] ss:$8 sps:$4 sm:$0xff]  }
  0xc5   :  { %1707 = vmatpush1.bf16.msra.mxu1 %v3583_v31  ;;  %v134_v31 = vld [vmem:[#allocation6 + $0x1a8] sm:$0xff] }
  0xc6   :  { %1708 = vmatprep.subr.bf16.mxu1 %v3592_v32  ;;  %1879 = vmatpush1.bf16.msra.mxu0 %v3587_v21  ;;  %v3604_v32 = vcombine.high %v331_v25, %v335_v26  ;;  %v3402_v34 = vcombine.high %v130_v30, %v134_v31  ;;  %v3401_v38 = vcombine.low %v130_v30, %v134_v31  ;;  %v206_v21 = vld [vmem:[#allocation6 + $0x3e8] sm:$0xff]  ;;  %v3847_v30 = vld [vmem:[#allocation8 + $0x70] ss:$8 sps:$4 sm:$0xff]  }
  0xc7   :  { %1880 = vmatprep.subr.bf16.mxu0 %v3596_v24  ;;  %v3844_v24 = vld [vmem:[#allocation8 + $0x60] ss:$8 sps:$4 sm:$0xff]  }
  0xc8   :  { %v210_v26 = vld [vmem:[#allocation6 + $0x408] sm:$0xff] }
  0xc9   :  { %1709 = vmatpush1.bf16.msra.mxu1 %v3591_v39  ;;  %v3410_v39 = vcombine.high %v138_v36, %v142_v37  ;;  %v3850_v36 = vld [vmem:[#allocation8 + $0x80] ss:$8 sps:$4 sm:$0xff]  }
  0xca   :  { %1710 = vmatprep.subr.bf16.mxu1 %v3600_v40  ;;  %1881 = vmatpush1.bf16.msra.mxu0 %v3595_v29  ;;  %v146_v40 = vld [vmem:[#allocation6 + $0x208] sm:$0xff] }
  0xcb   :  { %1882 = vmatprep.subr.bf16.mxu0 %v3604_v32  ;;  %v3418_v43 = vcombine.high %v146_v40, %v150_v41  ;;  %v218_v32 = vld [vmem:[#allocation6 + $0x448] sm:$0xff] }
  0xcd   :  { %1711 = vmatpush1.bf16.msra.mxu1 %v3599_v47  ;;  %v3417_v47 = vcombine.low %v146_v40, %v150_v41  ;;  %v3855_v40 = vld [vmem:[#allocation8 + $0x94] ss:$8 sps:$4 sm:$0xff]  }
  0xce   :  { %1723 = vmatprep.subr.bf16.mxu1 %v3354_v49  ;;  %1883 = vmatpush1.bf16.msra.mxu0 %v3603_v35  ;;  %v3826_v49 = vld [vmem:[#allocation8] ss:$8 sps:$4 sm:$0xff]  }
  0xcf   :  { %2936 = vmatprep.subr.bf16.mxu0 %v3828_v46  ;;  %v3858_v46 = vld [vmem:[#allocation8 + $0xa4] ss:$8 sps:$4 sm:$0xff]  }
  0xd0   :  { %1713 = vmatmul.mubr.bf16.vlgmr.msra.gmra.mrb[0].mxu1 %v4260_v54 }
  0xd1   :  { %1724 = vmatpush1.bf16.msra.mxu1 %v3353_v58  ;;  %1755 = vmatprep.mubr.bf16.mxu1 %v4263_v3  ;;  %v3434_v58 = vcombine.high %v162_v51, %v166_v52  ;;  %v246_v51 = vld [vmem:[#allocation6 + $0x528] sm:$0xff]  ;;  %v3861_v52 = vld [vmem:[#allocation8 + $0xb4] ss:$8 sps:$4 sm:$0xff]  }
  0xd2   :  { %1725 = vmatprep.subr.bf16.mxu1 %v3362_v59  ;;  %1885 = vmatmul.mubr.bf16.vlgmr.msra.gmra.mrb[0].mxu0 %v4260_v54  ;;  %v170_v59 = vld [vmem:[#allocation6 + $0x2c8] sm:$0xff] }
  0xd3   :  { %2937 = vmatpush1.bf16.msra.mxu0 %v3826_v49  ;;  %v3442_v0 = vcombine.high %v170_v59, %v174_v60  ;;  %v3441_v5 = vcombine.low %v170_v59, %v174_v60  ;;  %v3856_v49 = vld [vmem:[#allocation8 + $0xa0] ss:$8 sps:$4 sm:$0xff]   ;;  %v3864_v59 = vld [vmem:[#allocation8 + $0xc4] ss:$8 sps:$4 sm:$0xff]  }
  0xd4   :  { %2938 = vmatprep.subr.bf16.mxu0 %v3831_v53  ;;  %v3859_v53 = vld [vmem:[#allocation8 + $0xb0] ss:$8 sps:$4 sm:$0xff]  }
  0xd5   :  { %1726 = vmatpush1.bf16.msra.mxu1 %v3361_v2  ;;  %v182_v2 = vld [vmem:[#allocation6 + $0x328] sm:$0xff] }
  0xd6   :  { %1727 = vmatprep.subr.bf16.mxu1 %v3370_v4  ;;  %v3837_v4 = vld [vmem:[#allocation8 + $0x34] ss:$8 sps:$4 sm:$0xff]   ;;  %v3450_v7 = vcombine.high %v178_v1, %v182_v2 }
  0xd7   :  { %2939 = vmatpush1.bf16.msra.mxu0 %v3829_v57  ;;  %v250_v57 = vld [vmem:[#allocation6 + $0x548] sm:$0xff] }
  0xd8   :  { %2940 = vmatprep.subr.bf16.mxu0 %v3834_v61  ;;  %v3862_v61 = vld [vmem:[#allocation8 + $0xc0] ss:$8 sps:$4 sm:$0xff]  }
  0xd9   :  { %1728 = vmatpush1.bf16.msra.mxu1 %v3369_v11  ;;  %v3449_v11 = vcombine.low %v178_v1, %v182_v2  ;;  %v3867_v1 = vld [vmem:[#allocation8 + $0xd4] ss:$8 sps:$4 sm:$0xff]  }
  0xda   :  { %1729 = vmatprep.subr.bf16.mxu1 %v3378_v12  ;;  %v3838_v12 = vld [vmem:[#allocation8 + $0x40] ss:$8 sps:$4 sm:$0xff]  }
  0xdb   :  { %2941 = vmatpush1.bf16.msra.mxu0 %v3832_v63  ;;  %v258_v63 = vld [vmem:[#allocation6 + $0x588] sm:$0xff] }
  0xdc   :  { %2942 = vmatprep.subr.bf16.mxu0 %v3837_v4  ;;  %v3865_v4 = vld [vmem:[#allocation8 + $0xd0] ss:$8 sps:$4 sm:$0xff]  }
  0xdd   :  { %1730 = vmatpush1.bf16.msra.mxu1 %v3377_v19  ;;  %v3466_v19 = vcombine.high %v194_v14, %v198_v15  ;;  %v3873_v14 = vld [vmem:[#allocation8 + $0xf4] ss:$8 sps:$4 sm:$0xff]  }
  0xde   :  { %1731 = vmatprep.subr.bf16.mxu1 %v3386_v20  ;;  %v202_v20 = vld [vmem:[#allocation6 + $0x3c8] sm:$0xff] }
  0xdf   :  { %2943 = vmatpush1.bf16.msra.mxu0 %v3835_v6  ;;  %v3474_v25 = vcombine.high %v202_v20, %v206_v21  ;;  %v3473_v29 = vcombine.low %v202_v20, %v206_v21  ;;  %v266_v6 = vld [vmem:[#allocation6 + $0x5c8] sm:$0xff] }
  0xe0   :  { %2944 = vmatprep.subr.bf16.mxu0 %v3840_v10  ;;  %v3868_v10 = vld [vmem:[#allocation8 + $0xe0] ss:$8 sps:$4 sm:$0xff]  }
  0xe1   :  { %1732 = vmatpush1.bf16.msra.mxu1 %v3385_v27  ;;  %v214_v27 = vld [vmem:[#allocation6 + $0x428] sm:$0xff] }
  0xe2   :  { %1733 = vmatprep.subr.bf16.mxu1 %v3394_v28  ;;  %v3849_v28 = vld [vmem:[#allocation8 + $0x74] ss:$8 sps:$4 sm:$0xff]   ;;  %v3482_v31 = vcombine.high %v210_v26, %v214_v27  ;;  %v3481_v35 = vcombine.low %v210_v26, %v214_v27  ;;  %v298_v26 = vld [vmem:[#allocation6 + $0x6c8] sm:$0xff] }
  0xe3   :  { %2945 = vmatpush1.bf16.msra.mxu0 %v3838_v12  ;;  %v274_v12 = vld [vmem:[#allocation6 + $0x608] sm:$0xff] }
  0xe4   :  { %2946 = vmatprep.subr.bf16.mxu0 %v3843_v16  ;;  %v3871_v16 = vld [vmem:[#allocation8 + $0xf0] ss:$8 sps:$4 sm:$0xff]   ;;  %v302_v27 = vld [vmem:[#allocation6 + $0x6e8] sm:$0xff] }
  0xe5   :  { %1734 = vmatpush1.bf16.msra.mxu1 %v3393_v33  ;;  %v222_v33 = vld [vmem:[#allocation6 + $0x468] sm:$0xff] }
  0xe6   :  { %1735 = vmatprep.subr.bf16.mxu1 %v3402_v34  ;;  %v3852_v34 = vld [vmem:[#allocation8 + $0x84] ss:$8 sps:$4 sm:$0xff]   ;;  %v3490_v37 = vcombine.high %v218_v32, %v222_v33  ;;  %v3489_v41 = vcombine.low %v218_v32, %v222_v33  ;;  %v3569_v32 = vcombine.low %v298_v26, %v302_v27 }
  0xe7   :  { %2947 = vmatpush1.bf16.msra.mxu0 %v3841_v18  ;;  %v282_v18 = vld [vmem:[#allocation6 + $0x648] sm:$0xff] }
  0xe8   :  { %2948 = vmatprep.subr.bf16.mxu0 %v3846_v22  ;;  %v290_v22 = vld [vmem:[#allocation6 + $0x688] sm:$0xff] }
  0xe9   :  { %1736 = vmatpush1.bf16.msra.mxu1 %v3401_v38  ;;  %v226_v38 = vld [vmem:[#allocation6 + $0x488] sm:$0xff] }
  0xea   :  { %1737 = vmatprep.subr.bf16.mxu1 %v3410_v39  ;;  %v230_v39 = vld [vmem:[#allocation6 + $0x4a8] sm:$0xff] }
  0xeb   :  { %2949 = vmatpush1.bf16.msra.mxu0 %v3844_v24 }
  0xec   :  { %2950 = vmatprep.subr.bf16.mxu0 %v3849_v28 }
  0xed   :  { %1738 = vmatpush1.bf16.msra.mxu1 %v3409_v42  ;;  %v3853_v42 = vld [vmem:[#allocation8 + $0x90] ss:$8 sps:$4 sm:$0xff]  }
  0xee   :  { %1739 = vmatprep.subr.bf16.mxu1 %v3418_v43  ;;  %v3498_v43 = vcombine.high %v226_v38, %v230_v39 }
  0xef   :  { %2951 = vmatpush1.bf16.msra.mxu0 %v3847_v30  ;;  %v306_v30 = vld [vmem:[#allocation6 + $0x708] sm:$0xff] }
  0xf0   :  { %2952 = vmatprep.subr.bf16.mxu0 %v3852_v34  ;;  %v314_v34 = vld [vmem:[#allocation6 + $0x748] sm:$0xff] }
  0xf1   :  { %1740 = vmatpush1.bf16.msra.mxu1 %v3417_v47  ;;  %v3497_v47 = vcombine.low %v226_v38, %v230_v39  ;;  %v322_v38 = vld [vmem:[#allocation6 + $0x788] sm:$0xff] }
  0xf2   :  { %1741 = vmatprep.subr.bf16.mxu1 %v3426_v50  ;;  %v3506_v50 = vcombine.high %v234_v44, %v238_v45  ;;  %v326_v39 = vld [vmem:[#allocation6 + $0x7a8] sm:$0xff] }
  0xf3   :  { %2953 = vmatpush1.bf16.msra.mxu0 %v3850_v36 }
  0xf4   :  { %2954 = vmatprep.subr.bf16.mxu0 %v3855_v40 }
  0xf5   :  { %1742 = vmatpush1.bf16.msra.mxu1 %v3425_v56 }
  0xf6   :  { %1743 = vmatprep.subr.bf16.mxu1 %v3434_v58  ;;  %v254_v58 = vld [vmem:[#allocation6 + $0x568] sm:$0xff] }
  0xf7   :  { %2955 = vmatpush1.bf16.msra.mxu0 %v3853_v42  ;;  %v3521_v2 = vcombine.low %v250_v57, %v254_v58  ;;  %v330_v42 = vld [vmem:[#allocation6 + $0x7c8] sm:$0xff] }
  0xf8   :  { %2956 = vmatprep.subr.bf16.mxu0 %v3858_v46  ;;  %v84_v46 = vld [vmem:[#allocation6 + $0x18] sm:$0xff] }
  0xf9   :  { %1744 = vmatpush1.bf16.msra.mxu1 %v3433_v62  ;;  %v3522_v62 = vcombine.high %v250_v57, %v254_v58  ;;  %v3876_v57 = vld [vmem:[#allocation8 + $0x104] ss:$8 sps:$4 sm:$0xff]  }
  0xfa   :  { %1745 = vmatprep.subr.bf16.mxu1 %v3442_v0  ;;  %v262_v0 = vld [vmem:[#allocation6 + $0x5a8] sm:$0xff] }
  0xfb   :  { %2957 = vmatpush1.bf16.msra.mxu0 %v3856_v49  ;;  %v3529_v9 = vcombine.low %v258_v63, %v262_v0 }
  0xfc   :  { %2958 = vmatprep.subr.bf16.mxu0 %v3861_v52 }
  0xfd   :  { %1746 = vmatpush1.bf16.msra.mxu1 %v3441_v5  ;;  %v3530_v5 = vcombine.high %v258_v63, %v262_v0  ;;  %v116_v0 = vld [vmem:[#allocation6 + $0x118] sm:$0xff] }
  0xfe   :  { %1747 = vmatprep.subr.bf16.mxu1 %v3450_v7  ;;  %v270_v7 = vld [vmem:[#allocation6 + $0x5e8] sm:$0xff] }
  0xff   :  { %2959 = vmatpush1.bf16.msra.mxu0 %v3859_v53  ;;  %v3537_v15 = vcombine.low %v266_v6, %v270_v7  ;;  %v100_v53 = vld [vmem:[#allocation6 + $0x98] sm:$0xff] }
 0x100   :  { %2960 = vmatprep.subr.bf16.mxu0 %v3864_v59 }
 0x101   :  { %1748 = vmatpush1.bf16.msra.mxu1 %v3449_v11  ;;  %v3538_v11 = vcombine.high %v266_v6, %v270_v7  ;;  %v132_v7 = vld [vmem:[#allocation6 + $0x198] sm:$0xff] }
 0x102   :  { %1749 = vmatprep.subr.bf16.mxu1 %v3458_v13  ;;  %v278_v13 = vld [vmem:[#allocation6 + $0x628] sm:$0xff] }
 0x103   :  { %2961 = vmatpush1.bf16.msra.mxu0 %v3862_v61  ;;  %v3545_v20 = vcombine.low %v274_v12, %v278_v13  ;;  %v112_v61 = vld [vmem:[#allocation6 + $0xf8] sm:$0xff] }
 0x104   :  { %2962 = vmatprep.subr.bf16.mxu0 %v3867_v1  ;;  %v120_v1 = vld [vmem:[#allocation6 + $0x138] sm:$0xff] }
 0x105   :  { %1750 = vmatpush1.bf16.msra.mxu1 %v3457_v17  ;;  %v3546_v17 = vcombine.high %v274_v12, %v278_v13  ;;  %v3389_v6 = vcombine.low %v116_v0, %v120_v1  ;;  %v144_v12 = vld [vmem:[#allocation6 + $0x1f8] sm:$0xff] }
 0x106   :  { %1751 = vmatprep.subr.bf16.mxu1 %v3466_v19  ;;  %v286_v19 = vld [vmem:[#allocation6 + $0x668] sm:$0xff] }
 0x107   :  { %2963 = vmatpush1.bf16.msra.mxu0 %v3865_v4  ;;  %v3554_v21 = vcombine.high %v282_v18, %v286_v19  ;;  %v3553_v24 = vcombine.low %v282_v18, %v286_v19  ;;  %v124_v4 = vld [vmem:[#allocation6 + $0x158] sm:$0xff] }
 0x108   :  { %2964 = vmatprep.subr.bf16.mxu0 %v3870_v8  ;;  %v136_v8 = vld [vmem:[#allocation6 + $0x1b8] sm:$0xff] }
 0x109   :  { %1752 = vmatpush1.bf16.msra.mxu1 %v3465_v23  ;;  %v294_v23 = vld [vmem:[#allocation6 + $0x6a8] sm:$0xff]  ;;  %v3405_v13 = vcombine.low %v132_v7, %v136_v8  ;;  %v156_v19 = vld [vmem:[#allocation6 + $0x258] sm:$0xff] }
 0x10a   :  { %1753 = vmatprep.subr.bf16.mxu1 %v3474_v25  ;;  %v3562_v25 = vcombine.high %v290_v22, %v294_v23  ;;  %v3561_v28 = vcombine.low %v290_v22, %v294_v23  ;;  %v164_v23 = vld [vmem:[#allocation6 + $0x298] sm:$0xff] }
 0x10b   :  { %2965 = vmatpush1.bf16.msra.mxu0 %v3868_v10  ;;  %v3406_v10 = vcombine.high %v132_v7, %v136_v8  ;;  %v252_v7 = vld [vmem:[#allocation6 + $0x558] sm:$0xff] }
 0x10c   :  { %2966 = vmatprep.subr.bf16.mxu0 %v3873_v14  ;;  %v256_v8 = vld [vmem:[#allocation6 + $0x578] sm:$0xff] }
 0x10d   :  { %1754 = vmatpush1.bf16.msra.mxu1 %v3473_v29  ;;  %v3570_v29 = vcombine.high %v298_v26, %v302_v27  ;;  %v172_v27 = vld [vmem:[#allocation6 + $0x2d8] sm:$0xff] }
 0x10e   :  { %1766 = vmatprep.subr.bf16.mxu1 %v3482_v31  ;;  %v310_v31 = vld [vmem:[#allocation6 + $0x728] sm:$0xff] }
 0x10f   :  { %2967 = vmatpush1.bf16.msra.mxu0 %v3871_v16  ;;  %v3578_v33 = vcombine.high %v306_v30, %v310_v31  ;;  %v3577_v36 = vcombine.low %v306_v30, %v310_v31  ;;  %v152_v16 = vld [vmem:[#allocation6 + $0x238] sm:$0xff] }
 0x110   :  { %1756 = vmatmul.mubr.bf16.vlgmr.msra.gmra.mrb[4].mxu1 %v4252_v48  ;;  %v242_v48 = vld [vmem:[#allocation6 + $0x508] sm:$0xff]  ;;  %2979 = vmatprep.subr.bf16.mxu0 %v3876_v57  ;;  %v180_v31 = vld [vmem:[#allocation6 + $0x318] sm:$0xff] }
 0x111   :  { %1767 = vmatpush1.bf16.msra.mxu1 %v3481_v35  ;;  %1798 = vmatprep.mubr.bf16.mxu1 %v4254_v55  ;;  %v3505_v55 = vcombine.low %v234_v44, %v238_v45  ;;  %v3514_v56 = vcombine.high %v242_v48, %v246_v51  ;;  %v3513_v60 = vcombine.low %v242_v48, %v246_v51  ;;  %v318_v35 = vld [vmem:[#allocation6 + $0x768] sm:$0xff]  ;;  %v92_v48 = vld [vmem:[#allocation6 + $0x58] sm:$0xff] }
 0x112   :  { %1768 = vmatprep.subr.bf16.mxu1 %v3490_v37  ;;  %v3586_v37 = vcombine.high %v314_v34, %v318_v35  ;;  %v3585_v40 = vcombine.low %v314_v34, %v318_v35  ;;  %v3593_v44 = vcombine.low %v322_v38, %v326_v39  ;;  %v96_v51 = vld [vmem:[#allocation6 + $0x78] sm:$0xff] }
 0x113   :  { %v3365_v58 = vcombine.low %v92_v48, %v96_v51  ;;  %v188_v35 = vld [vmem:[#allocation6 + $0x358] sm:$0xff] }
 0x114   :  { %v232_v57 = vld [vmem:[#allocation6 + $0x4b8] sm:$0xff] }
 0x115   :  { %1769 = vmatpush1.bf16.msra.mxu1 %v3489_v41  ;;  %v3594_v41 = vcombine.high %v322_v38, %v326_v39  ;;  %v196_v39 = vld [vmem:[#allocation6 + $0x398] sm:$0xff] }
 0x116   :  { %1770 = vmatprep.subr.bf16.mxu1 %v3498_v43  ;;  %v334_v43 = vld [vmem:[#allocation6 + $0x7e8] sm:$0xff] }
 0x117   :  { %v3602_v45 = vcombine.high %v330_v42, %v334_v43  ;;  %v3601_v49 = vcombine.low %v330_v42, %v334_v43  ;;  %v204_v43 = vld [vmem:[#allocation6 + $0x3d8] sm:$0xff] }
 0x119   :  { %1771 = vmatpush1.bf16.msra.mxu1 %v3497_v47  ;;  %v88_v47 = vld [vmem:[#allocation6 + $0x38] sm:$0xff] }
 0x11a   :  { %1772 = vmatprep.subr.bf16.mxu1 %v3506_v50  ;;  %v3358_v50 = vcombine.high %v84_v46, %v88_v47  ;;  %v3357_v52 = vcombine.low %v84_v46, %v88_v47  ;;  %v212_v47 = vld [vmem:[#allocation6 + $0x418] sm:$0xff] }
 0x11d   :  { %1773 = vmatpush1.bf16.msra.mxu1 %v3505_v55  ;;  %v3366_v55 = vcombine.high %v92_v48, %v96_v51  ;;  %v220_v51 = vld [vmem:[#allocation6 + $0x458] sm:$0xff] }
 0x11e   :  { %1774 = vmatprep.subr.bf16.mxu1 %v3514_v56  ;;  %v104_v56 = vld [vmem:[#allocation6 + $0xb8] sm:$0xff] }
 0x11f   :  { %v3374_v59 = vcombine.high %v100_v53, %v104_v56 }
 0x121   :  { %1775 = vmatpush1.bf16.msra.mxu1 %v3513_v60  ;;  %v108_v60 = vld [vmem:[#allocation6 + $0xd8] sm:$0xff] }
 0x122   :  { %1776 = vmatprep.subr.bf16.mxu1 %v3522_v62  ;;  %v3373_v62 = vcombine.low %v100_v53, %v104_v56  ;;  %v3382_v63 = vcombine.high %v108_v60, %v112_v61  ;;  %v228_v56 = vld [vmem:[#allocation6 + $0x498] sm:$0xff] }
 0x125   :  { %1777 = vmatpush1.bf16.msra.mxu1 %v3521_v2  ;;  %v3381_v2 = vcombine.low %v108_v60, %v112_v61  ;;  %v4038_v60 = vld [vmem:[#allocation3 + $0xc] ss:$16 sps:$4 sm:$0xff]   ;;  %v3502_v61 = vcombine.high %v228_v56, %v232_v57 }
 0x126   :  { %1778 = vmatprep.subr.bf16.mxu1 %v3530_v5  ;;  %v128_v5 = vld [vmem:[#allocation6 + $0x178] sm:$0xff] }
 0x129   :  { %1779 = vmatpush1.bf16.msra.mxu1 %v3529_v9  ;;  %v3397_v9 = vcombine.low %v124_v4, %v128_v5 }
 0x12a   :  { %1780 = vmatprep.subr.bf16.mxu1 %v3538_v11  ;;  %v140_v11 = vld [vmem:[#allocation6 + $0x1d8] sm:$0xff] }
 0x12b   :  { %v3414_v14 = vcombine.high %v140_v11, %v144_v12 }
 0x12d   :  { %1781 = vmatpush1.bf16.msra.mxu1 %v3537_v15  ;;  %v148_v15 = vld [vmem:[#allocation6 + $0x218] sm:$0xff] }
 0x12e   :  { %1782 = vmatprep.subr.bf16.mxu1 %v3546_v17  ;;  %v3413_v17 = vcombine.low %v140_v11, %v144_v12  ;;  %v3422_v18 = vcombine.high %v148_v15, %v152_v16  ;;  %v4277_v11 = vld [vmem:[%s4336_s4] sm:$0xff] }
 0x131   :  { %1783 = vmatpush1.bf16.msra.mxu1 %v3545_v20  ;;  %v160_v20 = vld [vmem:[#allocation6 + $0x278] sm:$0xff] }
 0x132   :  { %1784 = vmatprep.subr.bf16.mxu1 %v3554_v21  ;;  %v3421_v21 = vcombine.low %v148_v15, %v152_v16  ;;  %v3430_v22 = vcombine.high %v156_v19, %v160_v20  ;;  %v264_v15 = vld [vmem:[#allocation6 + $0x5b8] sm:$0xff] }
 0x135   :  { %1785 = vmatpush1.bf16.msra.mxu1 %v3553_v24  ;;  %v168_v24 = vld [vmem:[#allocation6 + $0x2b8] sm:$0xff] }
 0x136   :  { %1786 = vmatprep.subr.bf16.mxu1 %v3562_v25  ;;  %v3429_v25 = vcombine.low %v156_v19, %v160_v20  ;;  %v3438_v26 = vcombine.high %v164_v23, %v168_v24 }
 0x139   :  { %1787 = vmatpush1.bf16.msra.mxu1 %v3561_v28  ;;  %v176_v28 = vld [vmem:[#allocation6 + $0x2f8] sm:$0xff] }
 0x13a   :  { %1788 = vmatprep.subr.bf16.mxu1 %v3570_v29  ;;  %v3437_v29 = vcombine.low %v164_v23, %v168_v24  ;;  %v3446_v30 = vcombine.high %v172_v27, %v176_v28 }
 0x13d   :  { %1789 = vmatpush1.bf16.msra.mxu1 %v3569_v32  ;;  %v184_v32 = vld [vmem:[#allocation6 + $0x338] sm:$0xff] }
 0x13e   :  { %1790 = vmatprep.subr.bf16.mxu1 %v3578_v33  ;;  %v3445_v33 = vcombine.low %v172_v27, %v176_v28  ;;  %v3454_v34 = vcombine.high %v180_v31, %v184_v32 }
 0x141   :  { %1791 = vmatpush1.bf16.msra.mxu1 %v3577_v36  ;;  %v192_v36 = vld [vmem:[#allocation6 + $0x378] sm:$0xff] }
 0x142   :  { %1792 = vmatprep.subr.bf16.mxu1 %v3586_v37  ;;  %v3453_v37 = vcombine.low %v180_v31, %v184_v32  ;;  %v3462_v38 = vcombine.high %v188_v35, %v192_v36  ;;  %v276_v32 = vld [vmem:[#allocation6 + $0x618] sm:$0xff] }
 0x145   :  { %1793 = vmatpush1.bf16.msra.mxu1 %v3585_v40  ;;  %v200_v40 = vld [vmem:[#allocation6 + $0x3b8] sm:$0xff] }
 0x146   :  { %1794 = vmatprep.subr.bf16.mxu1 %v3594_v41  ;;  %v3461_v41 = vcombine.low %v188_v35, %v192_v36  ;;  %v3470_v42 = vcombine.high %v196_v39, %v200_v40 }
 0x149   :  { %1795 = vmatpush1.bf16.msra.mxu1 %v3593_v44  ;;  %v208_v44 = vld [vmem:[#allocation6 + $0x3f8] sm:$0xff] }
 0x14a   :  { %1796 = vmatprep.subr.bf16.mxu1 %v3602_v45  ;;  %v3469_v45 = vcombine.low %v196_v39, %v200_v40  ;;  %v3478_v46 = vcombine.high %v204_v43, %v208_v44 }
 0x14d   :  { %1797 = vmatpush1.bf16.msra.mxu1 %v3601_v49  ;;  %v216_v49 = vld [vmem:[#allocation6 + $0x438] sm:$0xff] }
 0x14e   :  { %1895 = vmatprep.subr.bf16.mxu1 %v3358_v50  ;;  %v3477_v50 = vcombine.low %v204_v43, %v208_v44  ;;  %v3486_v48 = vcombine.high %v212_v47, %v216_v49  ;;  %v288_v43 = vld [vmem:[#allocation6 + $0x678] sm:$0xff]  ;;  %v3874_v44 = vld [vmem:[#allocation8 + $0x100] ss:$8 sps:$4 sm:$0xff]  }
 0x150   :  { %1799 = vmatmul.mubr.bf16.vlgmr.msra.gmra.mrb[4].mxu1 %v4260_v54  ;;  %v3390_v54 = vcombine.high %v116_v0, %v120_v1  ;;  %v1987_v0 = vlaneseq  ;;  %v3501_v1 = vcombine.low %v228_v56, %v232_v57  ;;  %v304_v56 = vld [vmem:[#allocation6 + $0x6f8] sm:$0xff]  ;;  %v3880_v57 = vld [vmem:[#allocation8 + $0x120] ss:$8 sps:$4 sm:$0xff]  }
 0x151   :  { %1896 = vmatpush1.bf16.msra.mxu1 %v3357_v52  ;;  %1927 = vmatprep.mubr.bf16.mxu1 %v4263_v3  ;;  %v3398_v3 = vcombine.high %v124_v4, %v128_v5  ;;  %v224_v52 = vld [vmem:[#allocation6 + $0x478] sm:$0xff] }
 0x152   :  { %1897 = vmatprep.subr.bf16.mxu1 %v3366_v55  ;;  %v3485_v55 = vcombine.low %v212_v47, %v216_v49  ;;  %v3494_v53 = vcombine.high %v220_v51, %v224_v52  ;;  %v248_v4 = vld [vmem:[#allocation6 + $0x538] sm:$0xff]  ;;  %v4271_v5 = vshrl.u32 %v1987_v0, 7 }
 0x153   :  { %v292_v49 = vld [vmem:[#allocation6 + $0x698] sm:$0xff] }
 0x154   :  { %v1993_v12 = vsub.s32 1, %v4271_v5  ;;  %v312_v0 = vld [vmem:[#allocation6 + $0x738] sm:$0xff] }
 0x155   :  { %1898 = vmatpush1.bf16.msra.mxu1 %v3365_v58  ;;  %v4037_v58 = vld [vmem:[#allocation3] ss:$16 sps:$4 sm:$0xff]  }
 0x156   :  { %1899 = vmatprep.subr.bf16.mxu1 %v3374_v59  ;;  %v3493_v59 = vcombine.low %v220_v51, %v224_v52  ;;  %v3882_v51 = vld [vmem:[#allocation8 + $0x124] ss:$8 sps:$4 sm:$0xff]  }
 0x159   :  { %1900 = vmatpush1.bf16.msra.mxu1 %v3373_v62  ;;  %v236_v62 = vld [vmem:[#allocation6 + $0x4d8] sm:$0xff] }
 0x15a   :  { %1901 = vmatprep.subr.bf16.mxu1 %v3382_v63  ;;  %v240_v63 = vld [vmem:[#allocation6 + $0x4f8] sm:$0xff] }
 0x15d   :  { %1902 = vmatpush1.bf16.msra.mxu1 %v3381_v2  ;;  %v3510_v2 = vcombine.high %v236_v62, %v240_v63 }
 0x15e   :  { %1903 = vmatprep.subr.bf16.mxu1 %v3390_v54  ;;  %v244_v54 = vld [vmem:[#allocation6 + $0x518] sm:$0xff] }
 0x161   :  { %1904 = vmatpush1.bf16.msra.mxu1 %v3389_v6  ;;  %v3509_v6 = vcombine.low %v236_v62, %v240_v63  ;;  %v2009_v62 = vsub.s32 5, %v4271_v5  ;;  %v308_v63 = vld [vmem:[#allocation6 + $0x718] sm:$0xff] }
 0x162   :  { %1905 = vmatprep.subr.bf16.mxu1 %v3398_v3  ;;  %v3518_v3 = vcombine.high %v244_v54, %v248_v4 }
 0x165   :  { %1906 = vmatpush1.bf16.msra.mxu1 %v3397_v9  ;;  %v1989_v9 = vsub.s32 0, %v4271_v5 }
 0x166   :  { %1907 = vmatprep.subr.bf16.mxu1 %v3406_v10  ;;  %v3517_v10 = vcombine.low %v244_v54, %v248_v4 }
 0x167   :  { %v1990_v16 = vrot.slane %v4277_v11, %v1989_v9 }
 0x169   :  { %1908 = vmatpush1.bf16.msra.mxu1 %v3405_v13  ;;  %v3526_v13 = vcombine.high %v252_v7, %v256_v8 }
 0x16a   :  { %1909 = vmatprep.subr.bf16.mxu1 %v3414_v14  ;;  %v260_v14 = vld [vmem:[#allocation6 + $0x598] sm:$0xff] }
 0x16b   :  { %v3534_v19 = vcombine.high %v260_v14, %v264_v15  ;;  %v3533_v27 = vcombine.low %v260_v14, %v264_v15  ;;  %v3581_v15 = vcombine.low %v308_v63, %v312_v0 }
 0x16d   :  { %1910 = vmatpush1.bf16.msra.mxu1 %v3413_v17  ;;  %v1994_v17 = vrot.slane %v4277_v11, %v1993_v12 }
 0x16e   :  { %1911 = vmatprep.subr.bf16.mxu1 %v3422_v18  ;;  %v3525_v18 = vcombine.low %v252_v7, %v256_v8  ;;  %v316_v7 = vld [vmem:[#allocation6 + $0x758] sm:$0xff] }
 0x16f   :  { %v320_v8 = vld [vmem:[#allocation6 + $0x778] sm:$0xff] }
 0x171   :  { %1912 = vmatpush1.bf16.msra.mxu1 %v3421_v21  ;;  %v268_v21 = vld [vmem:[#allocation6 + $0x5d8] sm:$0xff] }
 0x172   :  { %1913 = vmatprep.subr.bf16.mxu1 %v3430_v22  ;;  %v272_v22 = vld [vmem:[#allocation6 + $0x5f8] sm:$0xff] }
 0x175   :  { %1914 = vmatpush1.bf16.msra.mxu1 %v3429_v25 }
 0x176   :  { %1915 = vmatprep.subr.bf16.mxu1 %v3438_v26 }
 0x179   :  { %1916 = vmatpush1.bf16.msra.mxu1 %v3437_v29 }
 0x17a   :  { %1917 = vmatprep.subr.bf16.mxu1 %v3446_v30  ;;  %v3542_v30 = vcombine.high %v268_v21, %v272_v22 }
 0x17d   :  { %1918 = vmatpush1.bf16.msra.mxu1 %v3445_v33  ;;  %v280_v33 = vld [vmem:[#allocation6 + $0x638] sm:$0xff] }
 0x17e   :  { %1919 = vmatprep.subr.bf16.mxu1 %v3454_v34  ;;  %v3550_v40 = vcombine.high %v276_v32, %v280_v33 }
 0x181   :  { %1920 = vmatpush1.bf16.msra.mxu1 %v3453_v37 }
 0x182   :  { %1921 = vmatprep.subr.bf16.mxu1 %v3462_v38  ;;  %v3541_v38 = vcombine.low %v268_v21, %v272_v22  ;;  %v324_v21 = vld [vmem:[#allocation6 + $0x798] sm:$0xff] }
 0x183   :  { %v328_v22 = vld [vmem:[#allocation6 + $0x7b8] sm:$0xff] }
 0x185   :  { %1922 = vmatpush1.bf16.msra.mxu1 %v3461_v41 }
 0x186   :  { %1923 = vmatprep.subr.bf16.mxu1 %v3470_v42  ;;  %v284_v42 = vld [vmem:[#allocation6 + $0x658] sm:$0xff] }
 0x187   :  { %v3558_v47 = vcombine.high %v284_v42, %v288_v43  ;;  %v3557_v52 = vcombine.low %v284_v42, %v288_v43  ;;  %v3895_v42 = vld [vmem:[#allocation8 + $0x170] ss:$8 sps:$4 sm:$0xff]   ;;  %v3900_v43 = vld [vmem:[#allocation8 + $0x184] ss:$8 sps:$4 sm:$0xff]  }
 0x189   :  { %1924 = vmatpush1.bf16.msra.mxu1 %v3469_v45  ;;  %v3879_v45 = vld [vmem:[#allocation8 + $0x114] ss:$8 sps:$4 sm:$0xff]  }
 0x18a   :  { %1925 = vmatprep.subr.bf16.mxu1 %v3478_v46  ;;  %v3549_v46 = vcombine.low %v276_v32, %v280_v33  ;;  %v3598_v32 = vcombine.high %v324_v21, %v328_v22 }
 0x18d   :  { %1926 = vmatpush1.bf16.msra.mxu1 %v3477_v50  ;;  %v296_v50 = vld [vmem:[#allocation6 + $0x6b8] sm:$0xff] }
 0x18e   :  { %1938 = vmatprep.subr.bf16.mxu1 %v3486_v48  ;;  %v3877_v48 = vld [vmem:[#allocation8 + $0x110] ss:$8 sps:$4 sm:$0xff]  }
 0x190   :  { %1928 = vmatmul.mubr.bf16.vlgmr.msra.gmra.mrb[8].mxu1 %v4037_v58  ;;  %v3885_v58 = vld [vmem:[#allocation8 + $0x134] ss:$8 sps:$4 sm:$0xff]  }
 0x191   :  { %1939 = vmatpush1.bf16.msra.mxu1 %v3485_v55  ;;  %1970 = vmatprep.mubr.bf16.mxu1 %v4038_v60  ;;  %v3566_v55 = vcombine.high %v292_v49, %v296_v50  ;;  %v2005_v60 = vsub.s32 4, %v4271_v5 }
 0x192   :  { %1940 = vmatprep.subr.bf16.mxu1 %v3494_v53  ;;  %v300_v53 = vld [vmem:[#allocation6 + $0x6d8] sm:$0xff] }
 0x193   :  { %v3573_v54 = vcombine.low %v300_v53, %v304_v56  ;;  %v2006_v4 = vrot.slane %v4277_v11, %v2005_v60  ;;  %v3921_v60 = vld [vmem:[#allocation8 + $0x1f4] ss:$8 sps:$4 sm:$0xff]  }
 0x195   :  { %1941 = vmatpush1.bf16.msra.mxu1 %v3493_v59  ;;  %v3565_v59 = vcombine.low %v292_v49, %v296_v50  ;;  %v4039_v49 = vld [vmem:[#allocation3 + $0x8] ss:$16 sps:$4 sm:$0xff]   ;;  %v3906_v50 = vld [vmem:[#allocation8 + $0x1a4] ss:$8 sps:$4 sm:$0xff]  }
 0x196   :  { %1942 = vmatprep.subr.bf16.mxu1 %v3502_v61  ;;  %v3574_v61 = vcombine.high %v300_v53, %v304_v56  ;;  %v3910_v53 = vld [vmem:[#allocation8 + $0x1c0] ss:$8 sps:$4 sm:$0xff]   ;;  %v3915_v56 = vld [vmem:[#allocation8 + $0x1d4] ss:$8 sps:$4 sm:$0xff]  }
 0x199   :  { %1943 = vmatpush1.bf16.msra.mxu1 %v3501_v1  ;;  %v3883_v1 = vld [vmem:[#allocation8 + $0x130] ss:$8 sps:$4 sm:$0xff]  }
 0x19a   :  { %1944 = vmatprep.subr.bf16.mxu1 %v3510_v2  ;;  %v3888_v2 = vld [vmem:[#allocation8 + $0x144] ss:$8 sps:$4 sm:$0xff]  }
 0x19d   :  { %1945 = vmatpush1.bf16.msra.mxu1 %v3509_v6  ;;  %v3582_v6 = vcombine.high %v308_v63, %v312_v0  ;;  %v1997_v63 = vsub.s32 2, %v4271_v5  ;;  %v2001_v0 = vsub.s32 3, %v4271_v5 }
 0x19e   :  { %1946 = vmatprep.subr.bf16.mxu1 %v3518_v3  ;;  %v2010_v3 = vrot.slane %v4277_v11, %v2009_v62  ;;  %v3924_v62 = vld [vmem:[#allocation8 + $0x204] ss:$8 sps:$4 sm:$0xff]  }
 0x1a1   :  { %1947 = vmatpush1.bf16.msra.mxu1 %v3517_v10  ;;  %v3886_v10 = vld [vmem:[#allocation8 + $0x140] ss:$8 sps:$4 sm:$0xff]  }
 0x1a2   :  { %1948 = vmatprep.subr.bf16.mxu1 %v3526_v13  ;;  %v3891_v13 = vld [vmem:[#allocation8 + $0x154] ss:$8 sps:$4 sm:$0xff]  }
 0x1a3   :  { %v1714_v20 = vpop.f32.mrb[0].mxu1 }
 0x1a4   :  { %v2027_v23 = vadd.f32 %v1990_v16, %v1714_v20  ;;  %v1716_v24 = vpop.f32.mrb[1].mxu1 }
 0x1a5   :  { %v2028_v25 = vadd.f32 %v1994_v17, %v1716_v24  ;;  %v1718_v26 = vpop.f32.mrb[2].mxu1  ;;  %1949 = vmatpush1.bf16.msra.mxu1 %v3525_v18  ;;  %v1886_v14 = vpop.f32.mrb[0].mxu0  ;;  %v3590_v18 = vcombine.high %v316_v7, %v320_v8 }
 0x1a6   :  { %v2035_v28 = vadd.f32 %v1990_v16, %v1718_v26  ;;  %v1720_v29 = vpop.f32.mrb[3].mxu1  ;;  %1950 = vmatprep.subr.bf16.mxu1 %v3534_v19  ;;  %v2133_v34 = vmax.f32 %v2027_v23, 0.0  ;;  %v2031_v16 = vadd.f32 %v2006_v4, %v1886_v14  ;;  %v3889_v23 = vld [vmem:[#allocation8 + $0x150] ss:$8 sps:$4 sm:$0xff]  }
 0x1a7   :  { %v2036_v31 = vadd.f32 %v1994_v17, %v1720_v29  ;;  %v2134_v36 = vmax.f32 %v2028_v25, 0.0  ;;  %v1888_v17 = vpop.f32.mrb[1].mxu0 }
 0x1a8   :  { %v2141_v35 = vmax.f32 %v2035_v28, 0.0  ;;  %v2032_v19 = vadd.f32 %v2010_v3, %v1888_v17  ;;  %v1890_v20 = vpop.f32.mrb[2].mxu0  ;;  %v2137_v24 = vmax.f32 %v2031_v16, 0.0 }
 0x1a9   :  { %v2142_v37 = vmax.f32 %v2036_v31, 0.0  ;;  %1951 = vmatpush1.bf16.msra.mxu1 %v3533_v27  ;;  %v2039_v25 = vadd.f32 %v2006_v4, %v1890_v20  ;;  %v1892_v26 = vpop.f32.mrb[3].mxu0  ;;  %v3894_v27 = vld [vmem:[#allocation8 + $0x164] ss:$8 sps:$4 sm:$0xff]   ;;  %v3922_v20 = vld [vmem:[#allocation8 + $0x200] ss:$8 sps:$4 sm:$0xff]  }
 0x1aa   :  { %v2149_v39 = vpack.c.bf16 %v2141_v35, %v2133_v34  ;;  %1952 = vmatprep.subr.bf16.mxu1 %v3542_v30  ;;  %v2138_v28 = vmax.f32 %v2032_v19, 0.0  ;;  %v2040_v29 = vadd.f32 %v2010_v3, %v1892_v26  ;;  %v3589_v30 = vcombine.low %v316_v7, %v320_v8  ;;  %v332_v34 = vld [vmem:[#allocation6 + $0x7d8] sm:$0xff]  ;;  %v3930_v26 = vld [vmem:[#allocation8 + $0x224] ss:$8 sps:$4 sm:$0xff]  }
 0x1ab   :  { %v2150_v41 = vpack.c.bf16 %v2142_v37, %v2134_v36  ;;  %v2145_v31 = vmax.f32 %v2039_v25, 0.0  ;;  %v336_v35 = vld [vmem:[#allocation6 + $0x7f8] sm:$0xff]  ;;  %v3892_v36 = vld [vmem:[#allocation8 + $0x160] ss:$8 sps:$4 sm:$0xff]  }
 0x1ac   :  { %v2146_v33 = vmax.f32 %v2040_v29, 0.0  ;;  %v3925_v25 = vld [vmem:[#allocation8 + $0x210] ss:$8 sps:$4 sm:$0xff]   ;;  %v3928_v29 = vld [vmem:[#allocation8 + $0x220] ss:$8 sps:$4 sm:$0xff]  }
 0x1ad   :  { %1953 = vmatpush1.bf16.msra.mxu1 %v3541_v38  ;;  %2968 = vmatprep.mubr.bf16.mxu0 %v2150_v41  ;;  %v4290_v37 = vpack.c.bf16 %v2145_v31, %v2137_v24  ;;  %v3897_v38 = vld [vmem:[#allocation8 + $0x174] ss:$8 sps:$4 sm:$0xff]   ;;  %v3606_v41 = vcombine.high %v332_v34, %v336_v35  ;;  %v4020_v24 = vld [vmem:[#allocation9 + $0x48] sm:$0xff]  }
 0x1ae   :  { %2969 = vmatmul.mubr.bf16.vlgmr.msra.gmra.mrb[4].mxu0 %v2149_v39  ;;  %1954 = vmatprep.subr.bf16.mxu1 %v3550_v40  ;;  %v4292_v39 = vpack.c.bf16 %v2146_v33, %v2138_v28  ;;  %v3597_v40 = vcombine.low %v324_v21, %v328_v22  ;;  %v3927_v21 = vld [vmem:[#allocation8 + $0x214] ss:$8 sps:$4 sm:$0xff]   ;;  %v4018_v22 = vld [vmem:[#allocation9 + $0x40] sm:$0xff]   ;;  %v3931_v33 = vld [vmem:[#allocation8 + $0x230] ss:$8 sps:$4 sm:$0xff]  }
 0x1af   :  { %2980 = vmatpush1.bf16.msra.mxu0 %v3874_v44  ;;  %v3605_v44 = vcombine.low %v332_v34, %v336_v35  ;;  %v4022_v28 = vld [vmem:[#allocation9 + $0x50] sm:$0xff]   ;;  %v3936_v34 = vld [vmem:[#allocation8 + $0x244] ss:$8 sps:$4 sm:$0xff]   ;;  %v4025_v35 = vld [vmem:[#allocation9 + $0x18] sm:$0xff]  }
 0x1b0   :  { %2981 = vmatprep.subr.bf16.mxu0 %v3879_v45  ;;  %v3898_v45 = vld [vmem:[#allocation8 + $0x180] ss:$8 sps:$4 sm:$0xff]   ;;  %v4023_v31 = vld [vmem:[#allocation9 + $0x10] sm:$0xff]  }
 0x1b1   :  { %1955 = vmatpush1.bf16.msra.mxu1 %v3549_v46  ;;  %v3903_v46 = vld [vmem:[#allocation8 + $0x194] ss:$8 sps:$4 sm:$0xff]  }
 0x1b2   :  { %1956 = vmatprep.subr.bf16.mxu1 %v3558_v47  ;;  %v3901_v47 = vld [vmem:[#allocation8 + $0x190] ss:$8 sps:$4 sm:$0xff]  }
 0x1b3   :  { %2982 = vmatpush1.bf16.msra.mxu0 %v3877_v48  ;;  %v3904_v48 = vld [vmem:[#allocation8 + $0x1a0] ss:$8 sps:$4 sm:$0xff]  }
 0x1b4   :  { %2983 = vmatprep.subr.bf16.mxu0 %v3882_v51  ;;  %v3909_v51 = vld [vmem:[#allocation8 + $0x1b4] ss:$8 sps:$4 sm:$0xff]  }
 0x1b5   :  { %1957 = vmatpush1.bf16.msra.mxu1 %v3557_v52  ;;  %v3907_v52 = vld [vmem:[#allocation8 + $0x1b0] ss:$8 sps:$4 sm:$0xff]  }
 0x1b6   :  { %1958 = vmatprep.subr.bf16.mxu1 %v3566_v55  ;;  %v3912_v55 = vld [vmem:[#allocation8 + $0x1c4] ss:$8 sps:$4 sm:$0xff]  }
 0x1b7   :  { %2984 = vmatpush1.bf16.msra.mxu0 %v3880_v57  ;;  %v3913_v57 = vld [vmem:[#allocation8 + $0x1d0] ss:$8 sps:$4 sm:$0xff]  }
 0x1b8   :  { %2985 = vmatprep.subr.bf16.mxu0 %v3885_v58  ;;  %v3918_v58 = vld [vmem:[#allocation8 + $0x1e4] ss:$8 sps:$4 sm:$0xff]  }
 0x1b9   :  { %1959 = vmatpush1.bf16.msra.mxu1 %v3565_v59  ;;  %v3916_v59 = vld [vmem:[#allocation8 + $0x1e0] ss:$8 sps:$4 sm:$0xff]  }
 0x1ba   :  { %1960 = vmatprep.subr.bf16.mxu1 %v3574_v61  ;;  %v3919_v61 = vld [vmem:[#allocation8 + $0x1f0] ss:$8 sps:$4 sm:$0xff]  }
 0x1bb   :  { %2986 = vmatpush1.bf16.msra.mxu0 %v3883_v1  ;;  %v1998_v1 = vrot.slane %v4277_v11, %v1997_v63  ;;  %v3967_v63 = vld [vmem:[#allocation8 + $0x2f0] ss:$8 sps:$4 sm:$0xff]  }
 0x1bc   :  { %2987 = vmatprep.subr.bf16.mxu0 %v3888_v2  ;;  %v2002_v2 = vrot.slane %v4277_v11, %v2001_v0  ;;  %v3972_v0 = vld [vmem:[#allocation8 + $0x304] ss:$8 sps:$4 sm:$0xff]  }
 0x1bd   :  { %1961 = vmatpush1.bf16.msra.mxu1 %v3573_v54 }
 0x1be   :  { %1962 = vmatprep.subr.bf16.mxu1 %v3582_v6 }
 0x1bf   :  { %2988 = vmatpush1.bf16.msra.mxu0 %v3886_v10 }
 0x1c0   :  { %2989 = vmatprep.subr.bf16.mxu0 %v3891_v13 }
 0x1c1   :  { %1963 = vmatpush1.bf16.msra.mxu1 %v3581_v15 }
 0x1c2   :  { %1964 = vmatprep.subr.bf16.mxu1 %v3590_v18 }
 0x1c3   :  { %2990 = vmatpush1.bf16.msra.mxu0 %v3889_v23  ;;  %v4019_v23 = vld [vmem:[#allocation9] sm:$0xff]  }
 0x1c4   :  { %2991 = vmatprep.subr.bf16.mxu0 %v3894_v27  ;;  %v4021_v27 = vld [vmem:[#allocation9 + $0x8] sm:$0xff]  }
 0x1c5   :  { %1965 = vmatpush1.bf16.msra.mxu1 %v3589_v30  ;;  %v3933_v30 = vld [vmem:[#allocation8 + $0x234] ss:$8 sps:$4 sm:$0xff]  }
 0x1c6   :  { %1966 = vmatprep.subr.bf16.mxu1 %v3598_v32  ;;  %v4024_v32 = vld [vmem:[#allocation9 + $0x58] sm:$0xff]  }
 0x1c7   :  { %2992 = vmatpush1.bf16.msra.mxu0 %v3892_v36  ;;  %v4026_v36 = vld [vmem:[#allocation9 + $0x60] sm:$0xff]  }
 0x1c8   :  { %2993 = vmatprep.subr.bf16.mxu0 %v3897_v38  ;;  %v3934_v38 = vld [vmem:[#allocation8 + $0x240] ss:$8 sps:$4 sm:$0xff]  }
 0x1c9   :  { %1967 = vmatpush1.bf16.msra.mxu1 %v3597_v40  ;;  %v4027_v40 = vld [vmem:[#allocation9 + $0x20] sm:$0xff]  }
 0x1ca   :  { %1968 = vmatprep.subr.bf16.mxu1 %v3606_v41  ;;  %v4028_v41 = vld [vmem:[#allocation9 + $0x68] sm:$0xff]  }
 0x1cb   :  { %2994 = vmatpush1.bf16.msra.mxu0 %v3895_v42  ;;  %v3937_v42 = vld [vmem:[#allocation8 + $0x250] ss:$8 sps:$4 sm:$0xff]  }
 0x1cc   :  { %2995 = vmatprep.subr.bf16.mxu0 %v3900_v43  ;;  %v3942_v43 = vld [vmem:[#allocation8 + $0x264] ss:$8 sps:$4 sm:$0xff]  }
 0x1cd   :  { %1969 = vmatpush1.bf16.msra.mxu1 %v3605_v44  ;;  %v3940_v44 = vld [vmem:[#allocation8 + $0x260] ss:$8 sps:$4 sm:$0xff]  }
 0x1ce   :  { %3753 = vmatprep.subr.bf16.mxu1 %v4018_v22  ;;  %v4002_v22 = vld [vmem:[#allocation8 + $0x3a4] ss:$8 sps:$4 sm:$0xff]  }
 0x1cf   :  { %2996 = vmatpush1.bf16.msra.mxu0 %v3898_v45  ;;  %v3945_v45 = vld [vmem:[#allocation8 + $0x274] ss:$8 sps:$4 sm:$0xff]  }
 0x1d0   :  { %1971 = vmatmul.mubr.bf16.vlgmr.msra.gmra.mrb[8].mxu1 %v4039_v49  ;;  %2997 = vmatprep.subr.bf16.mxu0 %v3903_v46  ;;  %v3943_v46 = vld [vmem:[#allocation8 + $0x270] ss:$8 sps:$4 sm:$0xff]   ;;  %v3946_v49 = vld [vmem:[#allocation8 + $0x280] ss:$8 sps:$4 sm:$0xff]  }
 0x1d1   :  { %3754 = vmatpush3.bf16.msra.mxu1 %v4019_v23  ;;  %v4000_v23 = vld [vmem:[#allocation8 + $0x3a0] ss:$8 sps:$4 sm:$0xff]  }
 0x1d2   :  { %3755 = vmatprep.subr.bf16.mxu1 %v4020_v24  ;;  %v4005_v24 = vld [vmem:[#allocation8 + $0x3b4] ss:$8 sps:$4 sm:$0xff]  }
 0x1d3   :  { %2998 = vmatpush1.bf16.msra.mxu0 %v3901_v47  ;;  %v3948_v47 = vld [vmem:[#allocation8 + $0x284] ss:$8 sps:$4 sm:$0xff]  }
 0x1d4   :  { %2999 = vmatprep.subr.bf16.mxu0 %v3906_v50  ;;  %v3951_v50 = vld [vmem:[#allocation8 + $0x294] ss:$8 sps:$4 sm:$0xff]  }
 0x1d5   :  { %3756 = vmatpush3.bf16.msra.mxu1 %v4021_v27  ;;  %v4006_v27 = vld [vmem:[#allocation8 + $0x3c0] ss:$8 sps:$4 sm:$0xff]  }
 0x1d6   :  { %3757 = vmatprep.subr.bf16.mxu1 %v4022_v28  ;;  %v4011_v28 = vld [vmem:[#allocation8 + $0x3d4] ss:$8 sps:$4 sm:$0xff]  }
 0x1d7   :  { %3000 = vmatpush1.bf16.msra.mxu0 %v3904_v48  ;;  %v3949_v48 = vld [vmem:[#allocation8 + $0x290] ss:$8 sps:$4 sm:$0xff]  }
 0x1d8   :  { %3001 = vmatprep.subr.bf16.mxu0 %v3909_v51  ;;  %v3954_v51 = vld [vmem:[#allocation8 + $0x2a4] ss:$8 sps:$4 sm:$0xff]  }
 0x1d9   :  { %3758 = vmatpush3.bf16.msra.mxu1 %v4023_v31  ;;  %v4009_v31 = vld [vmem:[#allocation8 + $0x3d0] ss:$8 sps:$4 sm:$0xff]  }
 0x1da   :  { %3759 = vmatprep.subr.bf16.mxu1 %v4024_v32 }
 0x1db   :  { %3002 = vmatpush1.bf16.msra.mxu0 %v3907_v52  ;;  %v3952_v52 = vld [vmem:[#allocation8 + $0x2a0] ss:$8 sps:$4 sm:$0xff]  }
 0x1dc   :  { %3003 = vmatprep.subr.bf16.mxu0 %v3912_v55  ;;  %v3957_v55 = vld [vmem:[#allocation8 + $0x2b4] ss:$8 sps:$4 sm:$0xff]  }
 0x1dd   :  { %3760 = vmatpush3.bf16.msra.mxu1 %v4025_v35 }
 0x1de   :  { %3761 = vmatprep.subr.bf16.mxu1 %v4026_v36  ;;  %v4012_v36 = vld [vmem:[#allocation8 + $0x3e0] ss:$8 sps:$4 sm:$0xff]  }
 0x1df   :  { %3004 = vmatpush1.bf16.msra.mxu0 %v3910_v53  ;;  %v3955_v53 = vld [vmem:[#allocation8 + $0x2b0] ss:$8 sps:$4 sm:$0xff]  }
 0x1e0   :  { %3005 = vmatprep.subr.bf16.mxu0 %v3915_v56  ;;  %v3960_v56 = vld [vmem:[#allocation8 + $0x2c4] ss:$8 sps:$4 sm:$0xff]  }
 0x1e1   :  { %3762 = vmatpush3.bf16.msra.mxu1 %v4027_v40  ;;  %v4017_v40 = vld [vmem:[#allocation8 + $0x3f4] ss:$8 sps:$4 sm:$0xff]  }
 0x1e2   :  { %3763 = vmatprep.subr.bf16.mxu1 %v4028_v41 }
 0x1e3   :  { %3006 = vmatpush1.bf16.msra.mxu0 %v3913_v57  ;;  %v3958_v57 = vld [vmem:[#allocation8 + $0x2c0] ss:$8 sps:$4 sm:$0xff]  }
 0x1e4   :  { %3007 = vmatprep.subr.bf16.mxu0 %v3918_v58  ;;  %v3963_v58 = vld [vmem:[#allocation8 + $0x2d4] ss:$8 sps:$4 sm:$0xff]  }
 0x1e7   :  { %3008 = vmatpush1.bf16.msra.mxu0 %v3916_v59  ;;  %v3961_v59 = vld [vmem:[#allocation8 + $0x2d0] ss:$8 sps:$4 sm:$0xff]  }
 0x1e8   :  { %3009 = vmatprep.subr.bf16.mxu0 %v3921_v60  ;;  %v3966_v60 = vld [vmem:[#allocation8 + $0x2e4] ss:$8 sps:$4 sm:$0xff]  }
 0x1eb   :  { %3010 = vmatpush1.bf16.msra.mxu0 %v3919_v61  ;;  %v3964_v61 = vld [vmem:[#allocation8 + $0x2e0] ss:$8 sps:$4 sm:$0xff]  }
 0x1ec   :  { %3022 = vmatprep.subr.bf16.mxu0 %v3924_v62  ;;  %v3969_v62 = vld [vmem:[#allocation8 + $0x2f4] ss:$8 sps:$4 sm:$0xff]  }
 0x223   :  { %v1800_v54 = vpop.f32.mrb[4].mxu1 }
 0x224   :  { %v2029_v4 = vadd.f32 %v1998_v1, %v1800_v54  ;;  %v1802_v6 = vpop.f32.mrb[5].mxu1  ;;  %v3973_v54 = vld [vmem:[#allocation8 + $0x310] ss:$8 sps:$4 sm:$0xff]  }
 0x225   :  { %v2030_v3 = vadd.f32 %v2002_v2, %v1802_v6  ;;  %v1804_v7 = vpop.f32.mrb[6].mxu1  ;;  %v3976_v6 = vld [vmem:[#allocation8 + $0x320] ss:$8 sps:$4 sm:$0xff]  }
 0x226   :  { %v2037_v8 = vadd.f32 %v1998_v1, %v1804_v7  ;;  %v1806_v10 = vpop.f32.mrb[7].mxu1  ;;  %v2135_v14 = vmax.f32 %v2029_v4, 0.0  ;;  %v3970_v1 = vld [vmem:[#allocation8 + $0x300] ss:$8 sps:$4 sm:$0xff]   ;;  %v3978_v4 = vld [vmem:[#allocation8 + $0x324] ss:$8 sps:$4 sm:$0xff]  }
 0x227   :  { %v2038_v13 = vadd.f32 %v2002_v2, %v1806_v10  ;;  %v2136_v16 = vmax.f32 %v2030_v3, 0.0  ;;  %v3975_v2 = vld [vmem:[#allocation8 + $0x314] ss:$8 sps:$4 sm:$0xff]   ;;  %v3979_v7 = vld [vmem:[#allocation8 + $0x330] ss:$8 sps:$4 sm:$0xff]  }
 0x228   :  { %v2143_v15 = vmax.f32 %v2037_v8, 0.0  ;;  %v3981_v3 = vld [vmem:[#allocation8 + $0x334] ss:$8 sps:$4 sm:$0xff]   ;;  %v3984_v8 = vld [vmem:[#allocation8 + $0x344] ss:$8 sps:$4 sm:$0xff]  }
 0x229   :  { %v2144_v17 = vmax.f32 %v2038_v13, 0.0  ;;  %v3982_v10 = vld [vmem:[#allocation8 + $0x340] ss:$8 sps:$4 sm:$0xff]   ;;  %v3987_v13 = vld [vmem:[#allocation8 + $0x354] ss:$8 sps:$4 sm:$0xff]  }
 0x22a   :  { %v2151_v18 = vpack.c.bf16 %v2143_v15, %v2135_v14  ;;  %v3985_v14 = vld [vmem:[#allocation8 + $0x350] ss:$8 sps:$4 sm:$0xff]   ;;  %v3988_v15 = vld [vmem:[#allocation8 + $0x360] ss:$8 sps:$4 sm:$0xff]  }
 0x22b   :  { %v2152_v19 = vpack.c.bf16 %v2144_v17, %v2136_v16  ;;  %v3993_v16 = vld [vmem:[#allocation8 + $0x374] ss:$8 sps:$4 sm:$0xff]   ;;  %v3991_v17 = vld [vmem:[#allocation8 + $0x370] ss:$8 sps:$4 sm:$0xff]  }
 0x22d   :  { %3011 = vmatprep.mubr.bf16.mxu0 %v2152_v19  ;;  %v3994_v19 = vld [vmem:[#allocation8 + $0x380] ss:$8 sps:$4 sm:$0xff]  }
 0x22e   :  { %3012 = vmatmul.mubr.bf16.vlgmr.msra.gmra.mrb[4].mxu0 %v2151_v18  ;;  %v3996_v18 = vld [vmem:[#allocation8 + $0x384] ss:$8 sps:$4 sm:$0xff]  }
 0x22f   :  { %3023 = vmatpush1.bf16.msra.mxu0 %v3922_v20  ;;  %3054 = vmatprep.mubr.bf16.mxu0 %v4292_v39  ;;  %v3939_v39 = vld [vmem:[#allocation8 + $0x254] ss:$8 sps:$4 sm:$0xff]  }
 0x230   :  { %3024 = vmatprep.subr.bf16.mxu0 %v3927_v21  ;;  %v3999_v20 = vld [vmem:[#allocation8 + $0x394] ss:$8 sps:$4 sm:$0xff]   ;;  %v3997_v21 = vld [vmem:[#allocation8 + $0x390] ss:$8 sps:$4 sm:$0xff]  }
 0x233   :  { %3025 = vmatpush1.bf16.msra.mxu0 %v3925_v25  ;;  %v4003_v25 = vld [vmem:[#allocation8 + $0x3b0] ss:$8 sps:$4 sm:$0xff]  }
 0x234   :  { %3026 = vmatprep.subr.bf16.mxu0 %v3930_v26  ;;  %v4008_v26 = vld [vmem:[#allocation8 + $0x3c4] ss:$8 sps:$4 sm:$0xff]  }
 0x237   :  { %3027 = vmatpush1.bf16.msra.mxu0 %v3928_v29  ;;  %v2013_v29 = vsub.s32 6, %v4271_v5 }
 0x238   :  { %3028 = vmatprep.subr.bf16.mxu0 %v3933_v30  ;;  %v2017_v30 = vsub.s32 7, %v4271_v5 }
 0x239   :  { %v2014_v32 = vrot.slane %v4277_v11, %v2013_v29 }
 0x23b   :  { %3029 = vmatpush1.bf16.msra.mxu0 %v3931_v33  ;;  %v4014_v33 = vld [vmem:[#allocation8 + $0x3e4] ss:$8 sps:$4 sm:$0xff]  }
 0x23c   :  { %3030 = vmatprep.subr.bf16.mxu0 %v3936_v34  ;;  %v2018_v34 = vrot.slane %v4277_v11, %v2017_v30 }
 0x23f   :  { %3031 = vmatpush1.bf16.msra.mxu0 %v3934_v38 }
 0x240   :  { %3032 = vmatprep.subr.bf16.mxu0 %v3939_v39 }
 0x243   :  { %3033 = vmatpush1.bf16.msra.mxu0 %v3937_v42 }
 0x244   :  { %3034 = vmatprep.subr.bf16.mxu0 %v3942_v43 }
 0x247   :  { %3035 = vmatpush1.bf16.msra.mxu0 %v3940_v44 }
 0x248   :  { %3036 = vmatprep.subr.bf16.mxu0 %v3945_v45 }
 0x24b   :  { %3037 = vmatpush1.bf16.msra.mxu0 %v3943_v46  ;;  %v4015_v46 = vld [vmem:[#allocation8 + $0x3f0] ss:$8 sps:$4 sm:$0xff]  }
 0x24c   :  { %3038 = vmatprep.subr.bf16.mxu0 %v3948_v47 }
 0x24f   :  { %3039 = vmatpush1.bf16.msra.mxu0 %v3946_v49 }
 0x250   :  { %3040 = vmatprep.subr.bf16.mxu0 %v3951_v50 }
 0x253   :  { %3041 = vmatpush1.bf16.msra.mxu0 %v3949_v48 }
 0x254   :  { %3042 = vmatprep.subr.bf16.mxu0 %v3954_v51 }
 0x257   :  { %3043 = vmatpush1.bf16.msra.mxu0 %v3952_v52  ;;  %v4029_v52 = vld [vmem:[#allocation9 + $0x28] sm:$0xff]  }
 0x258   :  { %3044 = vmatprep.subr.bf16.mxu0 %v3957_v55  ;;  %3764 = vmatpush3.bf16.msra.mxu1 %v4029_v52  ;;  %v4030_v55 = vld [vmem:[#allocation9 + $0x70] sm:$0xff]  }
 0x259   :  { %3765 = vmatprep.subr.bf16.mxu1 %v4030_v55 }
 0x25b   :  { %3045 = vmatpush1.bf16.msra.mxu0 %v3955_v53  ;;  %v4031_v53 = vld [vmem:[#allocation9 + $0x30] sm:$0xff]  }
 0x25c   :  { %3046 = vmatprep.subr.bf16.mxu0 %v3960_v56  ;;  %3766 = vmatpush3.bf16.msra.mxu1 %v4031_v53  ;;  %v4032_v56 = vld [vmem:[#allocation9 + $0x78] sm:$0xff]  }
 0x25d   :  { %3767 = vmatprep.subr.bf16.mxu1 %v4032_v56 }
 0x25f   :  { %3047 = vmatpush1.bf16.msra.mxu0 %v3958_v57  ;;  %v4033_v57 = vld [vmem:[#allocation9 + $0x38] sm:$0xff]  }
 0x260   :  { %3048 = vmatprep.subr.bf16.mxu0 %v3963_v58  ;;  %3768 = vmatpush3.bf16.msra.mxu1 %v4033_v57  ;;  %v2114_v58 = vld [vmem:[%s4336_s4 + $0x8] sm:$0x3] }
 0x263   :  { %3049 = vmatpush1.bf16.msra.mxu0 %v3961_v59  ;;  %v2289_v59 = vrot.slane %v2114_v58, %v1989_v9 }
 0x264   :  { %3050 = vmatprep.subr.bf16.mxu0 %v3966_v60  ;;  %v2293_v60 = vrot.slane %v2114_v58, %v1993_v12 }
 0x267   :  { %3051 = vmatpush1.bf16.msra.mxu0 %v3964_v61 }
 0x268   :  { %3052 = vmatprep.subr.bf16.mxu0 %v3969_v62 }
 0x26b   :  { %3053 = vmatpush1.bf16.msra.mxu0 %v3967_v63 }
 0x26c   :  { %3065 = vmatprep.subr.bf16.mxu0 %v3972_v0 }
 0x26e   :  { %3055 = vmatmul.mubr.bf16.vlgmr.msra.gmra.mrb[4].mxu0 %v4290_v37  ;;  %v3990_v37 = vld [vmem:[#allocation8 + $0x364] ss:$8 sps:$4 sm:$0xff]  }
 0x26f   :  { %3066 = vmatpush1.bf16.msra.mxu0 %v3970_v1 }
 0x270   :  { %3067 = vmatprep.subr.bf16.mxu0 %v3975_v2 }
 0x273   :  { %3068 = vmatpush1.bf16.msra.mxu0 %v3973_v54 }
 0x274   :  { %3069 = vmatprep.subr.bf16.mxu0 %v3978_v4 }
 0x277   :  { %3070 = vmatpush1.bf16.msra.mxu0 %v3976_v6 }
 0x278   :  { %3071 = vmatprep.subr.bf16.mxu0 %v3981_v3 }
 0x27b   :  { %3072 = vmatpush1.bf16.msra.mxu0 %v3979_v7 }
 0x27c   :  { %3073 = vmatprep.subr.bf16.mxu0 %v3984_v8 }
 0x27f   :  { %3074 = vmatpush1.bf16.msra.mxu0 %v3982_v10 }
 0x280   :  { %3075 = vmatprep.subr.bf16.mxu0 %v3987_v13 }
 0x283   :  { %3076 = vmatpush1.bf16.msra.mxu0 %v3985_v14 }
 0x284   :  { %3077 = vmatprep.subr.bf16.mxu0 %v3990_v37 }
 0x287   :  { %3078 = vmatpush1.bf16.msra.mxu0 %v3988_v15 }
 0x288   :  { %3079 = vmatprep.subr.bf16.mxu0 %v3993_v16 }
 0x28b   :  { %3080 = vmatpush1.bf16.msra.mxu0 %v3991_v17 }
 0x28c   :  { %3081 = vmatprep.subr.bf16.mxu0 %v3996_v18 }
 0x28f   :  { %3082 = vmatpush1.bf16.msra.mxu0 %v3994_v19 }
 0x290   :  { %3083 = vmatprep.subr.bf16.mxu0 %v3999_v20 }
 0x293   :  { %3084 = vmatpush1.bf16.msra.mxu0 %v3997_v21 }
 0x294   :  { %3085 = vmatprep.subr.bf16.mxu0 %v4002_v22 }
 0x297   :  { %3086 = vmatpush1.bf16.msra.mxu0 %v4000_v23 }
 0x298   :  { %3087 = vmatprep.subr.bf16.mxu0 %v4005_v24 }
 0x29b   :  { %3088 = vmatpush1.bf16.msra.mxu0 %v4003_v25 }
 0x29c   :  { %3089 = vmatprep.subr.bf16.mxu0 %v4008_v26 }
 0x29f   :  { %3090 = vmatpush1.bf16.msra.mxu0 %v4006_v27 }
 0x2a0   :  { %3091 = vmatprep.subr.bf16.mxu0 %v4011_v28 }
 0x2a3   :  { %v1972_v35 = vpop.f32.mrb[8].mxu1  ;;  %3092 = vmatpush1.bf16.msra.mxu0 %v4009_v31 }
 0x2a4   :  { %v2033_v38 = vadd.f32 %v2014_v32, %v1972_v35  ;;  %v1974_v39 = vpop.f32.mrb[9].mxu1  ;;  %3093 = vmatprep.subr.bf16.mxu0 %v4014_v33 }
 0x2a5   :  { %v2034_v41 = vadd.f32 %v2018_v34, %v1974_v39  ;;  %v1976_v42 = vpop.f32.mrb[10].mxu1  ;;  %v3751_v39 = vld [vmem:[%s4336_s4 + $0xa] ss:$0 sm:$0xff] }
 0x2a6   :  { %v2041_v43 = vadd.f32 %v2014_v32, %v1976_v42  ;;  %v1978_v44 = vpop.f32.mrb[11].mxu1  ;;  %v2139_v47 = vmax.f32 %v2033_v38, 0.0  ;;  %v3752_v42 = vld [vmem:[%s4336_s4 + $0xb] ss:$0 sm:$0xff] }
 0x2a7   :  { %v2042_v45 = vadd.f32 %v2018_v34, %v1978_v44  ;;  %3094 = vmatpush1.bf16.msra.mxu0 %v4012_v36  ;;  %v2140_v50 = vmax.f32 %v2034_v41, 0.0 }
 0x2a8   :  { %v2147_v49 = vmax.f32 %v2041_v43, 0.0  ;;  %3095 = vmatprep.subr.bf16.mxu0 %v4017_v40 }
 0x2a9   :  { %v2148_v48 = vmax.f32 %v2042_v45, 0.0 }
 0x2aa   :  { %v2155_v11 = vpack.c.bf16 %v2147_v49, %v2139_v47 }
 0x2ab   :  { %v2156_v51 = vpack.c.bf16 %v2148_v48, %v2140_v50  ;;  %3096 = vmatpush1.bf16.msra.mxu0 %v4015_v46 }
 0x2ad   :  { %3097 = vmatprep.mubr.bf16.mxu0 %v2156_v51 }
 0x2ae   :  { %3098 = vmatmul.mubr.bf16.vlgmr.msra.gmra.mrb[4].mxu0 %v2155_v11 }
 0x381   :  { %v3099_v61 = vpop.f32.mrb[4].mxu0 }
 0x382   :  { %v3775_v62 = vadd.f32 %v3099_v61, %v2289_v59  ;;  %v3101_v63 = vpop.f32.mrb[5].mxu0 }
 0x383   :  { %v3776_v0 = vadd.f32 %v3101_v63, %v2293_v60  ;;  %v3103_v1 = vpop.f32.mrb[6].mxu0 }
 0x384   :  { %v3777_v2 = vadd.f32 %v3103_v1, %v2289_v59  ;;  %v3105_v54 = vpop.f32.mrb[7].mxu0  ;;  %v3108_v6 = vmax.f32 %v3775_v62, 0.0 }
 0x385   :  { %v3778_v4 = vadd.f32 %v3105_v54, %v2293_v60  ;;  %v3109_v7 = vmax.f32 %v3776_v0, 0.0 }
 0x386   :  { %v3110_v3 = vmax.f32 %v3777_v2, 0.0 }
 0x387   :  { %v3111_v8 = vmax.f32 %v3778_v4, 0.0 }
 0x388   :  { %v3112_v10 = vpack.c.bf16 %v3110_v3, %v3108_v6 }
 0x389   :  { %v3113_v13 = vpack.c.bf16 %v3111_v8, %v3109_v7 }
 0x38b   :  { %3274 = vmatprep.mubr.bf16.mxu1 %v3113_v13 }
 0x38c   :  { %3275 = vmatmul.mubr.bf16.vlgmr.msra.gmra.mrb[12].mxu1 %v3112_v10 }
 0x45f   :  { %v3769_v9 = vpop.f32.mrb[12].mxu1 }
 0x460   :  { %v3770_v14 = vpop.f32.mrb[13].mxu1 }
 0x461   :  { %v3771_v5 = vadd.f32 %v3770_v14, %v3769_v9  ;;  %v3772_v12 = vpop.f32.mrb[14].mxu1 }
 0x462   :  { %v3773_v37 = vpop.f32.mrb[15].mxu1 }
 0x463   :  { %v3774_v15 = vadd.f32 %v3773_v37, %v3772_v12 }
 0x465   :  { %v3283_v16 = vadd.f32 %v3774_v15, %v3771_v5 }
 0x467   :  { %v3284_v17 = vrot.slane %v3283_v16, 4 }
 0x469   :  { %v3285_v18 = vadd.f32 %v3284_v17, %v3283_v16 }
 0x46b   :  { %v3286_v19 = vrot.slane %v3285_v18, 2 }
 0x46d   :  { %v3287_v20 = vadd.f32 %v3286_v19, %v3285_v18 }
 0x46f   :  { %v3288_v21 = vrot.slane %v3287_v20, 1 }
 0x471   :  { %v3289_v22 = vadd.f32 %v3288_v21, %v3287_v20 }
 0x473   :  { %v3291_v23 = vmul.f32 0.0625, %v3289_v22 }
 0x475   :  { %v3292_v24 = vsub.f32 %v3771_v5, %v3291_v23  ;;  %v3293_v25 = vsub.f32 %v3774_v15, %v3291_v23 }
 0x477   :  { %v3294_v26 = vmul.f32 %v3292_v24, %v3292_v24  ;;  %v3295_v27 = vmul.f32 %v3293_v25, %v3293_v25 }
 0x479   :  { %v3296_v28 = vadd.f32 %v3295_v27, %v3294_v26 }
 0x47b   :  { %v3297_v29 = vrot.slane %v3296_v28, 4 }
 0x47d   :  { %v3298_v30 = vadd.f32 %v3297_v29, %v3296_v28 }
 0x47f   :  { %v3299_v31 = vrot.slane %v3298_v30, 2 }
 0x481   :  { %v3300_v32 = vadd.f32 %v3299_v31, %v3298_v30 }
 0x483   :  { %v3301_v33 = vrot.slane %v3300_v32, 1 }
 0x485   :  { %v3302_v34 = vadd.f32 %v3301_v33, %v3300_v32 }
 0x487   :  { %v3303_v35 = vmul.f32 0.0625, %v3302_v34 }
 0x489   :  { %v3304_v36 = vadd.f32 1e-05, %v3303_v35 }
 0x48b   :  { %4034 = vrsqrt.f32 %v3304_v36 }
 0x495   :  { %v4035_v38 = vpop.eup %4034 }
 0x496   :  { %v3306_v40 = vmul.f32 %v4035_v38, %v3292_v24  ;;  %v3307_v41 = vmul.f32 %v4035_v38, %v3293_v25 }
 0x498   :  { %v3315_v43 = vmul.f32 %v3751_v39, %v3307_v41  ;;  %v3314_v44 = vmul.f32 %v3751_v39, %v3306_v40 }
 0x49a   :  { %v3322_v45 = vadd.f32 %v3752_v42, %v3314_v44  ;;  %v3323_v46 = vadd.f32 %v3752_v42, %v3315_v43 }
 0x49c   :  { %v3324_v47 = vmax.f32 %v3322_v45, 0.0  ;;  %v3325_v49 = vmax.f32 %v3323_v46, 0.0 }
 0x49e   :  { %3326 = vst [vmem:[#allocation11] sm:$0xff] %v3324_v47  ;;  %3327 = vst [vmem:[#allocation11 + $0x8] sm:$0xff] %v3325_v49 }
 0x49f   :  { %4139 = shalt.err (!%p4136_p8)
}
 0x4a0   :  { %s4140_s7 = scalar_lea.hbm %s4337_s5, 256 }
 0x4a1   :  { %p4141_p9 = scmp.ne.s32.totalorder %s4337_s5, %s4140_s7  ;;  %p4144_p10 = scmp.lt.u32.totalorder %s4140_s7, %s4337_s5 }
 0x4a3   :  { %p4146_p11 = pnand %p4144_p10, %p4141_p9 }
 0x4a5   :  { %4149 = shalt.err (!%p4146_p11)
}
 0x4a6   :  { %3339 = dma.vmem_to_hbm [thread:$0]  %s3334_s28, 256, %s4337_s5, [#allocation5], %s4165_s0, %s4165_s0, %s4166_s30  }
 0x4a7   :  { %4156 = dma.done.wait [#allocation5], 256  }
 0x4a8   :  { %4157 = vsyncadd [#allocation5], 4294967040 }
 0x4a9   :  { %3343 = vsyncpa [#allocation4], 1 }
 0x4aa   :  { %3344 = vsyncpa [#allocation7], 1 }
 0x4ab   :  { %3345 = vsyncpa [#allocation10], 1 }
 0x4ac   :  { %3346 = vsyncpa [#allocation5], 1 }

</bundles_post_ra>
